<compile_context>
chip_gen: v7x
topology: tpu7x:2x2x1
jax: 0.10.0
libtpu: 0.0.40
codegen_flags: <defaults>
</compile_context>

<pallas_src>
import functools

import jax
import jax.numpy as jnp
from jax import lax
from jax.experimental import pallas as pl
from jax.experimental.pallas import tpu as pltpu

EPS = 1e-5
LANE = 128
TM_TARGET = 512                    # rows per M tile
TK_TARGET = 512                    # K tile
VMEM_LIMIT = 48 * 1024 * 1024      # fits v5e/v6e/v7x scoped VMEM


# ------------------------------- helpers --------------------------------------
def _round_up(x, m):
    return ((x + m - 1) // m) * m


def _pad_axis(a, axis, target):
    pad = target - a.shape[axis]
    if pad == 0:
        return a
    pads = [(0, 0)] * a.ndim
    pads[axis] = (0, pad)
    return jnp.pad(a, pads)


def _softsign_ref(v):
    return v / (1.0 + jnp.abs(v))


def _softsign_fast(v):
    # reciprocal goes to the (otherwise idle) EUP slot
    return v * pl.reciprocal(1.0 + jnp.abs(v), approx=True)


def _bn_scale_bias(v, gamma, beta, axes):
    # training-mode BatchNorm: biased variance, computed in f32
    v = v.astype(jnp.float32)
    mean = jnp.mean(v, axis=axes)
    var = jnp.mean(jnp.square(v - mean), axis=axes)
    scale = gamma / jnp.sqrt(var + EPS)
    return scale, beta - mean * scale


# ----------------------------- Pallas kernels ----------------------------------
def _bn_mm_kernel(x_ref, s_ref, b_ref, w_ref, o_ref, acc_ref, *, act_in, act_out):
    # out = [softsign?]( ([softsign?](x*s+b)) @ w )
    k = pl.program_id(1)

    @pl.when(k == 0)
    def _():
        acc_ref[...] = jnp.zeros_like(acc_ref)

    y = x_ref[...].astype(jnp.float32) * s_ref[...] + b_ref[...]
    if act_in:
        y = _softsign_fast(y)
    acc_ref[...] += jnp.dot(y.astype(jnp.bfloat16), w_ref[...],
                            preferred_element_type=jnp.float32)

    @pl.when(k == pl.num_programs(1) - 1)
    def _():
        v = acc_ref[...]
        if act_out:
            v = _softsign_fast(v)
        o_ref[...] = v.astype(o_ref.dtype)


def _bn_mm_res_kernel(x_ref, s_ref, b_ref, w_ref, r_ref, o_ref, acc_ref,
                      *, act_in, act_out):
    # out = [softsign?]( ([softsign?](x*s+b)) @ w ) + residual
    k = pl.program_id(1)

    @pl.when(k == 0)
    def _():
        acc_ref[...] = jnp.zeros_like(acc_ref)

    y = x_ref[...].astype(jnp.float32) * s_ref[...] + b_ref[...]
    if act_in:
        y = _softsign_fast(y)
    acc_ref[...] += jnp.dot(y.astype(jnp.bfloat16), w_ref[...],
                            preferred_element_type=jnp.float32)

    @pl.when(k == pl.num_programs(1) - 1)
    def _():
        v = acc_ref[...]
        if act_out:
            v = _softsign_fast(v)
        o_ref[...] = (v + r_ref[...].astype(jnp.float32)).astype(o_ref.dtype)


def _conv3x3_kernel(xp_ref, w_ref, o_ref, *, stride, ho, wo, cpp, cop):
    # xp_ref: (1, Hph, Wph, stride*stride*cpp)  bn2-affined, zero-padded, phase-packed bf16
    # w_ref : (9, cpp, cop)                     tap-major 3x3 weights, bf16
    # o_ref : (1, ho, wo, cop)                  softsign(conv2(...)), bf16
    def row(i, carry):
        acc = jnp.zeros((wo, cop), jnp.float32)
        for di in range(3):
            for dj in range(3):
                ph = (di % stride) * stride + (dj % stride)
                tap = xp_ref[0, i + di // stride,
                             pl.ds(dj // stride, wo),
                             pl.ds(ph * cpp, cpp)]
                acc = acc + jnp.dot(tap, w_ref[di * 3 + dj],
                                    preferred_element_type=jnp.float32)
        o_ref[0, i, :, :] = _softsign_fast(acc).astype(o_ref.dtype)
        return carry

    lax.fori_loop(0, ho, row, 0)


# ------------------------------ kernel wrappers --------------------------------
def fused_bn_matmul(x2d, scale, bias, w, *, act_in, act_out, residual=None,
                    out_dtype=jnp.float32):
    """Per-row: out = [softsign?]( ([softsign?](x*scale+bias)) @ w ) (+ residual)."""
    M, K = x2d.shape
    Kw, Nc = w.shape
    assert K == Kw and K % LANE == 0 and Nc % LANE == 0

    tm = min(TM_TARGET, _round_up(M, 8))
    Mp = _round_up(M, tm)
    tk = K
    if K > TK_TARGET:
        tk = TK_TARGET
        while K % tk:
            tk -= LANE
    grid = (Mp // tm, K // tk)

    xb = _pad_axis(x2d, 0, Mp).astype(jnp.bfloat16)
    sb = scale.reshape(1, K).astype(jnp.float32)
    bb = bias.reshape(1, K).astype(jnp.float32)
    wb = w.astype(jnp.bfloat16)

    in_specs = [
        pl.BlockSpec((tm, tk), lambda i, k: (i, k)),
        pl.BlockSpec((1, tk), lambda i, k: (0, k)),
        pl.BlockSpec((1, tk), lambda i, k: (0, k)),
        pl.BlockSpec((tk, Nc), lambda i, k: (k, 0)),
    ]
    args = [xb, sb, bb, wb]
    if residual is None:
        kernel = functools.partial(_bn_mm_kernel, act_in=act_in, act_out=act_out)
        res_bytes = 0
    else:
        rb = _pad_axis(residual, 0, Mp)
        in_specs.append(pl.BlockSpec((tm, Nc), lambda i, k: (i, 0)))
        args.append(rb)
        kernel = functools.partial(_bn_mm_res_kernel, act_in=act_in, act_out=act_out)
        res_bytes = Mp * Nc * rb.dtype.itemsize

    trans = (Mp * K if act_in else 0) + (Mp * Nc if act_out else 0)
    cost = pl.CostEstimate(
        flops=2 * Mp * K * Nc,
        transcendentals=trans,
        bytes_accessed=Mp * K * 2 + K * Nc * 2
        + Mp * Nc * jnp.dtype(out_dtype).itemsize + res_bytes)

    out = pl.pallas_call(
        kernel,
        out_shape=jax.ShapeDtypeStruct((Mp, Nc), out_dtype),
        grid_spec=pltpu.PrefetchScalarGridSpec(
            num_scalar_prefetch=0,
            grid=grid,
            in_specs=in_specs,
            out_specs=pl.BlockSpec((tm, Nc), lambda i, k: (i, 0)),
            scratch_shapes=[pltpu.VMEM((tm, Nc), jnp.float32)]),
        compiler_params=pltpu.CompilerParams(
            dimension_semantics=("parallel", "arbitrary"),
            vmem_limit_bytes=VMEM_LIMIT),
        cost_estimate=cost,
    )(*args)
    return out[:M]


def conv3x3_softsign(h, w_oihw, stride, planes, cpp):
    """softsign(conv3x3(h, w, stride, padding=1)); h is bn2-affined NHWC bf16,
    channels already zero-padded to cpp (multiple of 128)."""
    assert stride in (1, 2)
    N, H, W, C = h.shape
    assert C == cpp
    ho = (H - 1) // stride + 1
    wo = (W - 1) // stride + 1
    hp = stride * ho + 2
    wp = stride * wo + 2

    # zero-pad (the conv's padding=1 plus any stride-alignment slack)
    xp = jnp.pad(h, ((0, 0), (1, hp - H - 1), (1, wp - W - 1), (0, 0)))
    if stride == 2:
        # space-to-depth phase packing: the 9 taps become aligned, unit-stride
        # slices inside the kernel (no strided VMEM access needed).
        xp = xp.reshape(N, hp // 2, 2, wp // 2, 2, cpp)
        xp = xp.transpose(0, 1, 3, 2, 4, 5).reshape(N, hp // 2, wp // 2, 4 * cpp)
    hph, wph, cph = xp.shape[1], xp.shape[2], xp.shape[3]

    # (O, I, 3, 3) -> (9, I, O), tap-major, channel-padded, bf16
    w_t = jnp.transpose(w_oihw, (2, 3, 1, 0)).reshape(9, planes, planes)
    w_t = _pad_axis(_pad_axis(w_t, 1, cpp), 2, cpp).astype(jnp.bfloat16)

    cost = pl.CostEstimate(
        flops=2 * N * ho * wo * 9 * cpp * cpp,
        transcendentals=N * ho * wo * cpp,
        bytes_accessed=N * hph * wph * cph * 2 + 9 * cpp * cpp * 2
        + N * ho * wo * cpp * 2)

    kernel = functools.partial(_conv3x3_kernel, stride=stride, ho=ho, wo=wo,
                               cpp=cpp, cop=cpp)
    return pl.pallas_call(
        kernel,
        out_shape=jax.ShapeDtypeStruct((N, ho, wo, cpp), jnp.bfloat16),
        grid_spec=pltpu.PrefetchScalarGridSpec(
            num_scalar_prefetch=0,
            grid=(N,),
            in_specs=[pl.BlockSpec((1, hph, wph, cph), lambda n: (n, 0, 0, 0)),
                      pl.BlockSpec((9, cpp, cpp), lambda n: (0, 0, 0))],
            out_specs=pl.BlockSpec((1, ho, wo, cpp), lambda n: (n, 0, 0, 0))),
        compiler_params=pltpu.CompilerParams(
            dimension_semantics=("parallel",),
            vmem_limit_bytes=VMEM_LIMIT),
        cost_estimate=cost,
    )(xp.astype(jnp.bfloat16), w_t)


# ------------------------------- forward pass ----------------------------------
def preact_bottleneck(x_nchw, p, stride):
    expansion = 4
    N, cin, H, W = x_nchw.shape
    planes = p["w1"].shape[0]
    cout = expansion * planes
    has_shortcut = (stride != 1) or (cin != cout)

    cin_p = _round_up(cin, LANE)
    pln_p = _round_up(planes, LANE)
    cout_p = _round_up(cout, LANE)

    ho = (H - 1) // stride + 1
    wo = (W - 1) // stride + 1

    x = jnp.transpose(x_nchw, (0, 2, 3, 1)).astype(jnp.float32)      # NHWC
    x2d = x.reshape(N * H * W, cin)

    # bn1 statistics (f32 glue); affine + softsign fused into conv1/shortcut kernels
    s1, b1 = _bn_scale_bias(x2d, p["g1"], p["b1"], axes=0)
    s1p = _pad_axis(s1, 0, cin_p)
    b1p = _pad_axis(b1, 0, cin_p)
    x2d_p = _pad_axis(x2d, 1, cin_p)

    # conv1 (1x1): h1 = softsign(bn1(x)) @ w1
    w1 = _pad_axis(_pad_axis(p["w1"][:, :, 0, 0].T, 0, cin_p), 1, pln_p)
    h1 = fused_bn_matmul(x2d_p, s1p, b1p, w1, act_in=True, act_out=False,
                         out_dtype=jnp.bfloat16)                      # (N*H*W, pln_p)

    # shortcut (projection conv on softsign(bn1(x)), or identity on raw x)
    if has_shortcut:
        xs = x[:, ::stride, ::stride, :].reshape(N * ho * wo, cin)
        xs_p = _pad_axis(xs, 1, cin_p)
        w_sc = _pad_axis(_pad_axis(p["w_sc"][:, :, 0, 0].T, 0, cin_p), 1, cout_p)
        shortcut = fused_bn_matmul(xs_p, s1p, b1p, w_sc, act_in=True,
                                   act_out=False, out_dtype=jnp.float32)
    else:
        shortcut = _pad_axis(x2d, 1, cout_p)            # identity: pre-activation input

    # bn2: stats in f32 glue; the affine rides along with the (required)
    # zero-pad / space-to-depth pass feeding the conv2 kernel.
    h1v = h1.reshape(N, H, W, pln_p)
    s2, b2 = _bn_scale_bias(h1v[..., :planes], p["g2"], p["b2"], axes=(0, 1, 2))
    h1n = (h1v.astype(jnp.float32) * _pad_axis(s2, 0, pln_p)
           + _pad_axis(b2, 0, pln_p)).astype(jnp.bfloat16)

    # conv2 (3x3, stride, pad=1) + softsign, one Pallas kernel invocation per image
    h2 = conv3x3_softsign(h1n, p["w2"], stride, planes, pln_p)        # (N, ho, wo, pln_p)

    # bn3 folded into conv3 prologue; softsign + residual add fused in its epilogue
    s3, b3 = _bn_scale_bias(h2[..., :planes], p["g3"], p["b3"], axes=(0, 1, 2))
    w3 = _pad_axis(_pad_axis(p["w3"][:, :, 0, 0].T, 0, pln_p), 1, cout_p)
    h2f = h2.reshape(N * ho * wo, pln_p)
    out2d = fused_bn_matmul(h2f, _pad_axis(s3, 0, pln_p), _pad_axis(b3, 0, pln_p),
                            w3, act_in=False, act_out=True,
                            residual=shortcut, out_dtype=jnp.float32)

    out = out2d[:, :cout].reshape(N, ho, wo, cout)
    return jnp.transpose(out, (0, 3, 1, 2))                           # back to NCHW


# -------------------------- pure-JAX reference check ---------------------------
def ref_forward(x, p, stride):
    expansion = 4
    cin = x.shape[1]
    planes = p["w1"].shape[0]
    has_shortcut = (stride != 1) or (cin != expansion * planes)

    def bn(v, gamma, beta):
        mean = v.mean(axis=(0, 2, 3), keepdims=True)
        var = v.var(axis=(0, 2, 3), keepdims=True)       # biased, PyTorch train mode
        g = gamma.reshape(1, -1, 1, 1)
        b = beta.reshape(1, -1, 1, 1)
        return (v - mean) / jnp.sqrt(var + EPS) * g + b

    def conv(v, w, stride=1, pad=0):
        return lax.conv_general_dilated(
            v, w, (stride, stride), [(pad, pad), (pad, pad)],
            dimension_numbers=("NCHW", "OIHW", "NCHW"))

    out = _softsign_ref(bn(x, p["g1"], p["b1"]))
    shortcut = conv(out, p["w_sc"], stride) if has_shortcut else x
    out = conv(out, p["w1"])
    out = _softsign_ref(conv(bn(out, p["g2"], p["b2"]), p["w2"], stride, pad=1))
    out = _softsign_ref(conv(bn(out, p["g3"], p["b3"]), p["w3"]))
    return out + shortcut


if __name__ == "__main__":
    forward = jax.jit(preact_bottleneck, static_argnums=(2,))

    def make_params(key, in_planes, planes):
        exp = 4
        ks = jax.random.split(key, 10)
        n = jax.random.normal
        return {
            "g1": 1.0 + 0.1 * n(ks[0], (in_planes,), jnp.float32),
            "b1": 0.1 * n(ks[1], (in_planes,), jnp.float32),
            "g2": 1.0 + 0.1 * n(ks[2], (planes,), jnp.float32),
            "b2": 0.1 * n(ks[3], (planes,), jnp.float32),
            "g3": 1.0 + 0.1 * n(ks[4], (planes,), jnp.float32),
            "b3": 0.1 * n(ks[5], (planes,), jnp.float32),
            "w1": 0.2 * n(ks[6], (planes, in_planes, 1, 1), jnp.float32),
            "w2": 0.2 * n(ks[7], (planes, planes, 3, 3), jnp.float32),
            "w3": 0.2 * n(ks[8], (exp * planes, planes, 1, 1), jnp.float32),
            "w_sc": 0.2 * n(ks[9], (exp * planes, in_planes, 1, 1), jnp.float32),
        }

    key = jax.random.PRNGKey(0)
    N = 2
    configs = [
        # (in_planes, planes, H, W, stride)
        (16, 8, 8, 8, 1),   # projection shortcut (1x1 conv), stride 1
        (16, 8, 8, 8, 2),   # downsampling bottleneck
        (32, 8, 8, 8, 1),   # identity shortcut (in_planes == 4*planes)
    ]
    for idx, (cin, planes, H, W, stride) in enumerate(configs):
        kp, kx = jax.random.split(jax.random.fold_in(key, idx))
        params = make_params(kp, cin, planes)
        x = jax.random.normal(kx, (N, cin, H, W), jnp.float32)

        y = forward(x, params, stride)
        jax.block_until_ready(y)

        y_ref = ref_forward(x, params, stride)
        ho = (H - 1) // stride + 1
        wo = (W - 1) // stride + 1
        assert y.shape == (N, 4 * planes, ho, wo), y.shape
        err = float(jnp.max(jnp.abs(y - y_ref)))
        # bf16 MXU operands + approx-reciprocal softsign => relaxed tolerance
        assert err < 5e-2, f"config {idx}: max abs err {err}"

    print("KERNEL_OK")
</pallas_src>

<mosaic_0001>
module attributes {stable_mosaic.version = 11 : i64} {
  func.func @_bn_mm_kernel(%arg0: i32, %arg1: i32, %arg2: memref<128x128xbf16, #tpu.memory_space<vmem>>, %arg3: memref<1x128xf32, #tpu.memory_space<vmem>>, %arg4: memref<1x128xf32, #tpu.memory_space<vmem>>, %arg5: memref<128x128xbf16, #tpu.memory_space<vmem>>, %arg6: memref<128x128xbf16, #tpu.memory_space<vmem>>, %arg7: memref<128x128xf32, #tpu.memory_space<vmem>>) attributes {dimension_semantics = [#tpu.dimension_semantics<parallel>, #tpu.dimension_semantics<arbitrary>], iteration_bounds = array<i64: 1, 1>, scalar_prefetch = 0 : i64, scratch_operands = 1 : i64, tpu.core_type = #tpu.core_type<tc>, window_params = [{transform_indices = @transform_0, window_bounds = array<i64: 128, 128>}, {transform_indices = @transform_1, window_bounds = array<i64: 1, 128>}, {transform_indices = @transform_2, window_bounds = array<i64: 1, 128>}, {transform_indices = @transform_3, window_bounds = array<i64: 128, 128>}, {transform_indices = @transform_4, window_bounds = array<i64: 128, 128>}]} {
    %c0_i32 = arith.constant 0 : i32
    %0 = arith.cmpi eq, %arg1, %c0_i32 : i32
    %1 = arith.extui %0 : i1 to i32
    %c0_i32_0 = arith.constant 0 : i32
    %2 = arith.cmpi ne, %1, %c0_i32_0 : i32
    scf.if %2 {
      %cst_15 = arith.constant 0.000000e+00 : f32
      %25 = vector.broadcast %cst_15 : f32 to vector<128x128xf32>
      %c0_16 = arith.constant 0 : index
      %c0_17 = arith.constant 0 : index
      %26 = vector.load %arg7[%c0_16, %c0_17] : memref<128x128xf32, #tpu.memory_space<vmem>>, vector<128x128xf32>
      tpu.vector_store %arg7[%c0_16, %c0_17], %25 {strides = array<i32>} : memref<128x128xf32, #tpu.memory_space<vmem>>, vector<128x128xf32>,
    } else {
    }
    %c0 = arith.constant 0 : index
    %c0_1 = arith.constant 0 : index
    %3 = vector.load %arg2[%c0, %c0_1] : memref<128x128xbf16, #tpu.memory_space<vmem>>, vector<128x128xbf16>
    %4 = arith.extf %3 : vector<128x128xbf16> to vector<128x128xf32>
    %c0_2 = arith.constant 0 : index
    %c0_3 = arith.constant 0 : index
    %5 = vector.load %arg3[%c0_2, %c0_3] : memref<1x128xf32, #tpu.memory_space<vmem>>, vector<1x128xf32>
    %6 = vector.broadcast %5 : vector<1x128xf32> to vector<128x128xf32>
    %7 = arith.mulf %4, %6 : vector<128x128xf32>
    %c0_4 = arith.constant 0 : index
    %c0_5 = arith.constant 0 : index
    %8 = vector.load %arg4[%c0_4, %c0_5] : memref<1x128xf32, #tpu.memory_space<vmem>>, vector<1x128xf32>
    %9 = vector.broadcast %8 : vector<1x128xf32> to vector<128x128xf32>
    %10 = arith.addf %7, %9 : vector<128x128xf32>
    %11 = math.absf %10 : vector<128x128xf32>
    %cst = arith.constant 1.000000e+00 : f32
    %12 = vector.broadcast %cst : f32 to vector<128x128xf32>
    %13 = arith.addf %12, %11 : vector<128x128xf32>
    %14 = tpu.reciprocal %13 {approx = true} : vector<128x128xf32> -> vector<128x128xf32>
    %15 = arith.mulf %10, %14 : vector<128x128xf32>
    %c0_6 = arith.constant 0 : index
    %c0_7 = arith.constant 0 : index
    %16 = vector.load %arg7[%c0_6, %c0_7] : memref<128x128xf32, #tpu.memory_space<vmem>>, vector<128x128xf32>
    %17 = arith.truncf %15 : vector<128x128xf32> to vector<128x128xbf16>
    %c0_8 = arith.constant 0 : index
    %c0_9 = arith.constant 0 : index
    %18 = vector.load %arg5[%c0_8, %c0_9] : memref<128x128xbf16, #tpu.memory_space<vmem>>, vector<128x128xbf16>
    %cst_10 = arith.constant dense<0.000000e+00> : vector<128x128xf32>
    %19 = tpu.matmul %17, %18, %cst_10 {dimension_numbers = #tpu.dot_dimension_numbers<[1], [0], [0], [1], [0, 0, 1, 1], [], []>} : vector<128x128xbf16>, vector<128x128xbf16>, vector<128x128xf32> -> vector<128x128xf32>
    %20 = arith.addf %16, %19 : vector<128x128xf32>
    %c0_11 = arith.constant 0 : index
    %c0_12 = arith.constant 0 : index
    %21 = vector.load %arg7[%c0_11, %c0_12] : memref<128x128xf32, #tpu.memory_space<vmem>>, vector<128x128xf32>
    tpu.vector_store %arg7[%c0_11, %c0_12], %20 {strides = array<i32>} : memref<128x128xf32, #tpu.memory_space<vmem>>, vector<128x128xf32>,
    %c0_i32_13 = arith.constant 0 : i32
    %22 = arith.cmpi eq, %arg1, %c0_i32_13 : i32
    %23 = arith.extui %22 : i1 to i32
    %c0_i32_14 = arith.constant 0 : i32
    %24 = arith.cmpi ne, %23, %c0_i32_14 : i32
    scf.if %24 {
      %c0_15 = arith.constant 0 : index
      %c0_16 = arith.constant 0 : index
      %25 = vector.load %arg7[%c0_15, %c0_16] : memref<128x128xf32, #tpu.memory_space<vmem>>, vector<128x128xf32>
      %26 = arith.truncf %25 : vector<128x128xf32> to vector<128x128xbf16>
      %c0_17 = arith.constant 0 : index
      %c0_18 = arith.constant 0 : index
      %27 = vector.load %arg6[%c0_17, %c0_18] : memref<128x128xbf16, #tpu.memory_space<vmem>>, vector<128x128xbf16>
      tpu.vector_store %arg6[%c0_17, %c0_18], %26 {strides = array<i32>} : memref<128x128xbf16, #tpu.memory_space<vmem>>, vector<128x128xbf16>,
    } else {
    }
    return
  }
  func.func @transform_0(%arg0: i32, %arg1: i32) -> (i32, i32) {
    %c0_i32 = arith.constant 0 : i32
    return %arg0, %arg1 : i32, i32
  }
  func.func @transform_1(%arg0: i32, %arg1: i32) -> (i32, i32) {
    %c0_i32 = arith.constant 0 : i32
    %c0_i32_0 = arith.constant 0 : i32
    return %c0_i32, %arg1 : i32, i32
  }
  func.func @transform_2(%arg0: i32, %arg1: i32) -> (i32, i32) {
    %c0_i32 = arith.constant 0 : i32
    %c0_i32_0 = arith.constant 0 : i32
    return %c0_i32, %arg1 : i32, i32
  }
  func.func @transform_3(%arg0: i32, %arg1: i32) -> (i32, i32) {
    %c0_i32 = arith.constant 0 : i32
    %c0_i32_0 = arith.constant 0 : i32
    return %arg1, %c0_i32 : i32, i32
  }
  func.func @transform_4(%arg0: i32, %arg1: i32) -> (i32, i32) {
    %c0_i32 = arith.constant 0 : i32
    %c0_i32_0 = arith.constant 0 : i32
    return %arg0, %c0_i32 : i32, i32
  }
}

module attributes {stable_mosaic.version = 11 : i64} {
  func.func @_conv3x3_kernel(%arg0: i32, %arg1: memref<1x10x10x128xbf16, #tpu.memory_space<vmem>>, %arg2: memref<9x128x128xbf16, #tpu.memory_space<vmem>>, %arg3: memref<1x8x8x128xbf16, #tpu.memory_space<vmem>>) attributes {dimension_semantics = [#tpu.dimension_semantics<parallel>], iteration_bounds = array<i64: 2>, scalar_prefetch = 0 : i64, scratch_operands = 0 : i64, tpu.core_type = #tpu.core_type<tc>, window_params = [{transform_indices = @transform_0, window_bounds = array<i64: 1, 10, 10, 128>}, {pipeline_mode = #tpu.pipeline_mode<synchronous>, transform_indices = @transform_1, window_bounds = array<i64: 9, 128, 128>}, {transform_indices = @transform_2, window_bounds = array<i64: 1, 8, 8, 128>}]} {
    %c0_i32 = arith.constant 0 : i32
    %c8_i32 = arith.constant 8 : i32
    %0 = arith.addi %c0_i32, %c8_i32 : i32
    %c1_i32 = arith.constant 1 : i32
    scf.for %arg4 = %c0_i32 to %0 step %c1_i32  : i32 {
      %cst = arith.constant 0.000000e+00 : f32
      %1 = vector.broadcast %cst : f32 to vector<8x128xf32>
      %c0_i32_1 = arith.constant 0 : i32
      %2 = arith.addi %arg4, %c0_i32_1 : i32
      %c0 = arith.constant 0 : index
      %3 = arith.index_cast %2 : i32 to index
      %c0_2 = arith.constant 0 : index
      %c0_3 = arith.constant 0 : index
      %4 = vector.load %arg1[%c0, %3, %c0_2, %c0_3] : memref<1x10x10x128xbf16, #tpu.memory_space<vmem>>, vector<1x1x8x128xbf16>
      %5 = vector.shape_cast %4 : vector<1x1x8x128xbf16> to vector<8x128xbf16>
      %c0_4 = arith.constant 0 : index
      %c0_5 = arith.constant 0 : index
      %c0_6 = arith.constant 0 : index
      %6 = vector.load %arg2[%c0_4, %c0_5, %c0_6] : memref<9x128x128xbf16, #tpu.memory_space<vmem>>, vector<1x128x128xbf16>
      %7 = vector.shape_cast %6 : vector<1x128x128xbf16> to vector<128x128xbf16>
      %cst_7 = arith.constant dense<0.000000e+00> : vector<8x128xf32>
      %8 = tpu.matmul %5, %7, %cst_7 {dimension_numbers = #tpu.dot_dimension_numbers<[1], [0], [0], [1], [0, 0, 1, 1], [], []>} : vector<8x128xbf16>, vector<128x128xbf16>, vector<8x128xf32> -> vector<8x128xf32>
      %9 = arith.addf %1, %8 : vector<8x128xf32>
      %c0_i32_8 = arith.constant 0 : i32
      %10 = arith.addi %arg4, %c0_i32_8 : i32
      %c0_9 = arith.constant 0 : index
      %11 = arith.index_cast %10 : i32 to index
      %c1 = arith.constant 1 : index
      %c0_10 = arith.constant 0 : index
      %12 = vector.load %arg1[%c0_9, %11, %c1, %c0_10] : memref<1x10x10x128xbf16, #tpu.memory_space<vmem>>, vector<1x1x8x128xbf16>
      %13 = vector.shape_cast %12 : vector<1x1x8x128xbf16> to vector<8x128xbf16>
      %c1_11 = arith.constant 1 : index
      %c0_12 = arith.constant 0 : index
      %c0_13 = arith.constant 0 : index
      %14 = vector.load %arg2[%c1_11, %c0_12, %c0_13] : memref<9x128x128xbf16, #tpu.memory_space<vmem>>, vector<1x128x128xbf16>
      %15 = vector.shape_cast %14 : vector<1x128x128xbf16> to vector<128x128xbf16>
      %cst_14 = arith.constant dense<0.000000e+00> : vector<8x128xf32>
      %16 = tpu.matmul %13, %15, %cst_14 {dimension_numbers = #tpu.dot_dimension_numbers<[1], [0], [0], [1], [0, 0, 1, 1], [], []>} : vector<8x128xbf16>, vector<128x128xbf16>, vector<8x128xf32> -> vector<8x128xf32>
      %17 = arith.addf %9, %16 : vector<8x128xf32>
      %c0_i32_15 = arith.constant 0 : i32
      %18 = arith.addi %arg4, %c0_i32_15 : i32
      %c0_16 = arith.constant 0 : index
      %19 = arith.index_cast %18 : i32 to index
      %c2 = arith.constant 2 : index
      %c0_17 = arith.constant 0 : index
      %20 = vector.load %arg1[%c0_16, %19, %c2, %c0_17] : memref<1x10x10x128xbf16, #tpu.memory_space<vmem>>, vector<1x1x8x128xbf16>
      %21 = vector.shape_cast %20 : vector<1x1x8x128xbf16> to vector<8x128xbf16>
      %c2_18 = arith.constant 2 : index
      %c0_19 = arith.constant 0 : index
      %c0_20 = arith.constant 0 : index
      %22 = vector.load %arg2[%c2_18, %c0_19, %c0_20] : memref<9x128x128xbf16, #tpu.memory_space<vmem>>, vector<1x128x128xbf16>
      %23 = vector.shape_cast %22 : vector<1x128x128xbf16> to vector<128x128xbf16>
      %cst_21 = arith.constant dense<0.000000e+00> : vector<8x128xf32>
      %24 = tpu.matmul %21, %23, %cst_21 {dimension_numbers = #tpu.dot_dimension_numbers<[1], [0], [0], [1], [0, 0, 1, 1], [], []>} : vector<8x128xbf16>, vector<128x128xbf16>, vector<8x128xf32> -> vector<8x128xf32>
      %25 = arith.addf %17, %24 : vector<8x128xf32>
      %c1_i32_22 = arith.constant 1 : i32
      %26 = arith.addi %arg4, %c1_i32_22 : i32
      %c0_23 = arith.constant 0 : index
      %27 = arith.index_cast %26 : i32 to index
      %c0_24 = arith.constant 0 : index
      %c0_25 = arith.constant 0 : index
      %28 = vector.load %arg1[%c0_23, %27, %c0_24, %c0_25] : memref<1x10x10x128xbf16, #tpu.memory_space<vmem>>, vector<1x1x8x128xbf16>
      %29 = vector.shape_cast %28 : vector<1x1x8x128xbf16> to vector<8x128xbf16>
      %c3 = arith.constant 3 : index
      %c0_26 = arith.constant 0 : index
      %c0_27 = arith.constant 0 : index
      %30 = vector.load %arg2[%c3, %c0_26, %c0_27] : memref<9x128x128xbf16, #tpu.memory_space<vmem>>, vector<1x128x128xbf16>
      %31 = vector.shape_cast %30 : vector<1x128x128xbf16> to vector<128x128xbf16>
      %cst_28 = arith.constant dense<0.000000e+00> : vector<8x128xf32>
      %32 = tpu.matmul %29, %31, %cst_28 {dimension_numbers = #tpu.dot_dimension_numbers<[1], [0], [0], [1], [0, 0, 1, 1], [], []>} : vector<8x128xbf16>, vector<128x128xbf16>, vector<8x128xf32> -> vector<8x128xf32>
      %33 = arith.addf %25, %32 : vector<8x128xf32>
      %c1_i32_29 = arith.constant 1 : i32
      %34 = arith.addi %arg4, %c1_i32_29 : i32
      %c0_30 = arith.constant 0 : index
      %35 = arith.index_cast %34 : i32 to index
      %c1_31 = arith.constant 1 : index
      %c0_32 = arith.constant 0 : index
      %36 = vector.load %arg1[%c0_30, %35, %c1_31, %c0_32] : memref<1x10x10x128xbf16, #tpu.memory_space<vmem>>, vector<1x1x8x128xbf16>
      %37 = vector.shape_cast %36 : vector<1x1x8x128xbf16> to vector<8x128xbf16>
      %c4 = arith.constant 4 : index
      %c0_33 = arith.constant 0 : index
      %c0_34 = arith.constant 0 : index
      %38 = vector.load %arg2[%c4, %c0_33, %c0_34] : memref<9x128x128xbf16, #tpu.memory_space<vmem>>, vector<1x128x128xbf16>
      %39 = vector.shape_cast %38 : vector<1x128x128xbf16> to vector<128x128xbf16>
      %cst_35 = arith.constant dense<0.000000e+00> : vector<8x128xf32>
      %40 = tpu.matmul %37, %39, %cst_35 {dimension_numbers = #tpu.dot_dimension_numbers<[1], [0], [0], [1], [0, 0, 1, 1], [], []>} : vector<8x128xbf16>, vector<128x128xbf16>, vector<8x128xf32> -> vector<8x128xf32>
      %41 = arith.addf %33, %40 : vector<8x128xf32>
      %c1_i32_36 = arith.constant 1 : i32
      %42 = arith.addi %arg4, %c1_i32_36 : i32
      %c0_37 = arith.constant 0 : index
      %43 = arith.index_cast %42 : i32 to index
      %c2_38 = arith.constant 2 : index
      %c0_39 = arith.constant 0 : index
      %44 = vector.load %arg1[%c0_37, %43, %c2_38, %c0_39] : memref<1x10x10x128xbf16, #tpu.memory_space<vmem>>, vector<1x1x8x128xbf16>
      %45 = vector.shape_cast %44 : vector<1x1x8x128xbf16> to vector<8x128xbf16>
      %c5 = arith.constant 5 : index
      %c0_40 = arith.constant 0 : index
      %c0_41 = arith.constant 0 : index
      %46 = vector.load %arg2[%c5, %c0_40, %c0_41] : memref<9x128x128xbf16, #tpu.memory_space<vmem>>, vector<1x128x128xbf16>
      %47 = vector.shape_cast %46 : vector<1x128x128xbf16> to vector<128x128xbf16>
      %cst_42 = arith.constant dense<0.000000e+00> : vector<8x128xf32>
      %48 = tpu.matmul %45, %47, %cst_42 {dimension_numbers = #tpu.dot_dimension_numbers<[1], [0], [0], [1], [0, 0, 1, 1], [], []>} : vector<8x128xbf16>, vector<128x128xbf16>, vector<8x128xf32> -> vector<8x128xf32>
      %49 = arith.addf %41, %48 : vector<8x128xf32>
      %c2_i32 = arith.constant 2 : i32
      %50 = arith.addi %arg4, %c2_i32 : i32
      %c0_43 = arith.constant 0 : index
      %51 = arith.index_cast %50 : i32 to index
      %c0_44 = arith.constant 0 : index
      %c0_45 = arith.constant 0 : index
      %52 = vector.load %arg1[%c0_43, %51, %c0_44, %c0_45] : memref<1x10x10x128xbf16, #tpu.memory_space<vmem>>, vector<1x1x8x128xbf16>
      %53 = vector.shape_cast %52 : vector<1x1x8x128xbf16> to vector<8x128xbf16>
      %c6 = arith.constant 6 : index
      %c0_46 = arith.constant 0 : index
      %c0_47 = arith.constant 0 : index
      %54 = vector.load %arg2[%c6, %c0_46, %c0_47] : memref<9x128x128xbf16, #tpu.memory_space<vmem>>, vector<1x128x128xbf16>
      %55 = vector.shape_cast %54 : vector<1x128x128xbf16> to vector<128x128xbf16>
      %cst_48 = arith.constant dense<0.000000e+00> : vector<8x128xf32>
      %56 = tpu.matmul %53, %55, %cst_48 {dimension_numbers = #tpu.dot_dimension_numbers<[1], [0], [0], [1], [0, 0, 1, 1], [], []>} : vector<8x128xbf16>, vector<128x128xbf16>, vector<8x128xf32> -> vector<8x128xf32>
      %57 = arith.addf %49, %56 : vector<8x128xf32>
      %c2_i32_49 = arith.constant 2 : i32
      %58 = arith.addi %arg4, %c2_i32_49 : i32
      %c0_50 = arith.constant 0 : index
      %59 = arith.index_cast %58 : i32 to index
      %c1_51 = arith.constant 1 : index
      %c0_52 = arith.constant 0 : index
      %60 = vector.load %arg1[%c0_50, %59, %c1_51, %c0_52] : memref<1x10x10x128xbf16, #tpu.memory_space<vmem>>, vector<1x1x8x128xbf16>
      %61 = vector.shape_cast %60 : vector<1x1x8x128xbf16> to vector<8x128xbf16>
      %c7 = arith.constant 7 : index
      %c0_53 = arith.constant 0 : index
      %c0_54 = arith.constant 0 : index
      %62 = vector.load %arg2[%c7, %c0_53, %c0_54] : memref<9x128x128xbf16, #tpu.memory_space<vmem>>, vector<1x128x128xbf16>
      %63 = vector.shape_cast %62 : vector<1x128x128xbf16> to vector<128x128xbf16>
      %cst_55 = arith.constant dense<0.000000e+00> : vector<8x128xf32>
      %64 = tpu.matmul %61, %63, %cst_55 {dimension_numbers = #tpu.dot_dimension_numbers<[1], [0], [0], [1], [0, 0, 1, 1], [], []>} : vector<8x128xbf16>, vector<128x128xbf16>, vector<8x128xf32> -> vector<8x128xf32>
      %65 = arith.addf %57, %64 : vector<8x128xf32>
      %c2_i32_56 = arith.constant 2 : i32
      %66 = arith.addi %arg4, %c2_i32_56 : i32
      %c0_57 = arith.constant 0 : index
      %67 = arith.index_cast %66 : i32 to index
      %c2_58 = arith.constant 2 : index
      %c0_59 = arith.constant 0 : index
      %68 = vector.load %arg1[%c0_57, %67, %c2_58, %c0_59] : memref<1x10x10x128xbf16, #tpu.memory_space<vmem>>, vector<1x1x8x128xbf16>
      %69 = vector.shape_cast %68 : vector<1x1x8x128xbf16> to vector<8x128xbf16>
      %c8 = arith.constant 8 : index
      %c0_60 = arith.constant 0 : index
      %c0_61 = arith.constant 0 : index
      %70 = vector.load %arg2[%c8, %c0_60, %c0_61] : memref<9x128x128xbf16, #tpu.memory_space<vmem>>, vector<1x128x128xbf16>
      %71 = vector.shape_cast %70 : vector<1x128x128xbf16> to vector<128x128xbf16>
      %cst_62 = arith.constant dense<0.000000e+00> : vector<8x128xf32>
      %72 = tpu.matmul %69, %71, %cst_62 {dimension_numbers = #tpu.dot_dimension_numbers<[1], [0], [0], [1], [0, 0, 1, 1], [], []>} : vector<8x128xbf16>, vector<128x128xbf16>, vector<8x128xf32> -> vector<8x128xf32>
      %73 = arith.addf %65, %72 : vector<8x128xf32>
      %74 = math.absf %73 : vector<8x128xf32>
      %cst_63 = arith.constant 1.000000e+00 : f32
      %75 = vector.broadcast %cst_63 : f32 to vector<8x128xf32>
      %76 = arith.addf %75, %74 : vector<8x128xf32>
      %77 = tpu.reciprocal %76 {approx = true} : vector<8x128xf32> -> vector<8x128xf32>
      %78 = arith.mulf %73, %77 : vector<8x128xf32>
      %79 = arith.truncf %78 : vector<8x128xf32> to vector<8x128xbf16>
      %c0_64 = arith.constant 0 : index
      %80 = arith.index_cast %arg4 : i32 to index
      %c0_65 = arith.constant 0 : index
      %c0_66 = arith.constant 0 : index
      %81 = vector.load %arg3[%c0_64, %80, %c0_65, %c0_66] : memref<1x8x8x128xbf16, #tpu.memory_space<vmem>>, vector<1x1x8x128xbf16>
      %82 = vector.shape_cast %81 : vector<1x1x8x128xbf16> to vector<8x128xbf16>
      %83 = vector.shape_cast %79 : vector<8x128xbf16> to vector<1x1x8x128xbf16>
      tpu.vector_store %arg3[%c0_64, %80, %c0_65, %c0_66], %83 {strides = array<i32>} : memref<1x8x8x128xbf16, #tpu.memory_space<vmem>>, vector<1x1x8x128xbf16>,
    }
    %c8_i32_0 = arith.constant 8 : i32
    return
  }
  func.func @transform_0(%arg0: i32) -> (i32, i32, i32, i32) {
    %c0_i32 = arith.constant 0 : i32
    %c0_i32_0 = arith.constant 0 : i32
    %c0_i32_1 = arith.constant 0 : i32
    %c0_i32_2 = arith.constant 0 : i32
    return %arg0, %c0_i32, %c0_i32_0, %c0_i32_1 : i32, i32, i32, i32
  }
  func.func @transform_1(%arg0: i32) -> (i32, i32, i32) {
    %c0_i32 = arith.constant 0 : i32
    %c0_i32_0 = arith.constant 0 : i32
    %c0_i32_1 = arith.constant 0 : i32
    %c0_i32_2 = arith.constant 0 : i32
    return %c0_i32, %c0_i32_0, %c0_i32_1 : i32, i32, i32
  }
  func.func @transform_2(%arg0: i32) -> (i32, i32, i32, i32) {
    %c0_i32 = arith.constant 0 : i32
    %c0_i32_0 = arith.constant 0 : i32
    %c0_i32_1 = arith.constant 0 : i32
    %c0_i32_2 = arith.constant 0 : i32
    return %arg0, %c0_i32, %c0_i32_0, %c0_i32_1 : i32, i32, i32, i32
  }
}

module attributes {stable_mosaic.version = 11 : i64} {
  func.func @_bn_mm_kernel(%arg0: i32, %arg1: i32, %arg2: memref<128x128xbf16, #tpu.memory_space<vmem>>, %arg3: memref<1x128xf32, #tpu.memory_space<vmem>>, %arg4: memref<1x128xf32, #tpu.memory_space<vmem>>, %arg5: memref<128x128xbf16, #tpu.memory_space<vmem>>, %arg6: memref<128x128xf32, #tpu.memory_space<vmem>>, %arg7: memref<128x128xf32, #tpu.memory_space<vmem>>) attributes {dimension_semantics = [#tpu.dimension_semantics<parallel>, #tpu.dimension_semantics<arbitrary>], iteration_bounds = array<i64: 1, 1>, scalar_prefetch = 0 : i64, scratch_operands = 1 : i64, tpu.core_type = #tpu.core_type<tc>, window_params = [{transform_indices = @transform_0, window_bounds = array<i64: 128, 128>}, {transform_indices = @transform_1, window_bounds = array<i64: 1, 128>}, {transform_indices = @transform_2, window_bounds = array<i64: 1, 128>}, {transform_indices = @transform_3, window_bounds = array<i64: 128, 128>}, {transform_indices = @transform_4, window_bounds = array<i64: 128, 128>}]} {
    %c0_i32 = arith.constant 0 : i32
    %0 = arith.cmpi eq, %arg1, %c0_i32 : i32
    %1 = arith.extui %0 : i1 to i32
    %c0_i32_0 = arith.constant 0 : i32
    %2 = arith.cmpi ne, %1, %c0_i32_0 : i32
    scf.if %2 {
      %cst_15 = arith.constant 0.000000e+00 : f32
      %25 = vector.broadcast %cst_15 : f32 to vector<128x128xf32>
      %c0_16 = arith.constant 0 : index
      %c0_17 = arith.constant 0 : index
      %26 = vector.load %arg7[%c0_16, %c0_17] : memref<128x128xf32, #tpu.memory_space<vmem>>, vector<128x128xf32>
      tpu.vector_store %arg7[%c0_16, %c0_17], %25 {strides = array<i32>} : memref<128x128xf32, #tpu.memory_space<vmem>>, vector<128x128xf32>,
    } else {
    }
    %c0 = arith.constant 0 : index
    %c0_1 = arith.constant 0 : index
    %3 = vector.load %arg2[%c0, %c0_1] : memref<128x128xbf16, #tpu.memory_space<vmem>>, vector<128x128xbf16>
    %4 = arith.extf %3 : vector<128x128xbf16> to vector<128x128xf32>
    %c0_2 = arith.constant 0 : index
    %c0_3 = arith.constant 0 : index
    %5 = vector.load %arg3[%c0_2, %c0_3] : memref<1x128xf32, #tpu.memory_space<vmem>>, vector<1x128xf32>
    %6 = vector.broadcast %5 : vector<1x128xf32> to vector<128x128xf32>
    %7 = arith.mulf %4, %6 : vector<128x128xf32>
    %c0_4 = arith.constant 0 : index
    %c0_5 = arith.constant 0 : index
    %8 = vector.load %arg4[%c0_4, %c0_5] : memref<1x128xf32, #tpu.memory_space<vmem>>, vector<1x128xf32>
    %9 = vector.broadcast %8 : vector<1x128xf32> to vector<128x128xf32>
    %10 = arith.addf %7, %9 : vector<128x128xf32>
    %11 = math.absf %10 : vector<128x128xf32>
    %cst = arith.constant 1.000000e+00 : f32
    %12 = vector.broadcast %cst : f32 to vector<128x128xf32>
    %13 = arith.addf %12, %11 : vector<128x128xf32>
    %14 = tpu.reciprocal %13 {approx = true} : vector<128x128xf32> -> vector<128x128xf32>
    %15 = arith.mulf %10, %14 : vector<128x128xf32>
    %c0_6 = arith.constant 0 : index
    %c0_7 = arith.constant 0 : index
    %16 = vector.load %arg7[%c0_6, %c0_7] : memref<128x128xf32, #tpu.memory_space<vmem>>, vector<128x128xf32>
    %17 = arith.truncf %15 : vector<128x128xf32> to vector<128x128xbf16>
    %c0_8 = arith.constant 0 : index
    %c0_9 = arith.constant 0 : index
    %18 = vector.load %arg5[%c0_8, %c0_9] : memref<128x128xbf16, #tpu.memory_space<vmem>>, vector<128x128xbf16>
    %cst_10 = arith.constant dense<0.000000e+00> : vector<128x128xf32>
    %19 = tpu.matmul %17, %18, %cst_10 {dimension_numbers = #tpu.dot_dimension_numbers<[1], [0], [0], [1], [0, 0, 1, 1], [], []>} : vector<128x128xbf16>, vector<128x128xbf16>, vector<128x128xf32> -> vector<128x128xf32>
    %20 = arith.addf %16, %19 : vector<128x128xf32>
    %c0_11 = arith.constant 0 : index
    %c0_12 = arith.constant 0 : index
    %21 = vector.load %arg7[%c0_11, %c0_12] : memref<128x128xf32, #tpu.memory_space<vmem>>, vector<128x128xf32>
    tpu.vector_store %arg7[%c0_11, %c0_12], %20 {strides = array<i32>} : memref<128x128xf32, #tpu.memory_space<vmem>>, vector<128x128xf32>,
    %c0_i32_13 = arith.constant 0 : i32
    %22 = arith.cmpi eq, %arg1, %c0_i32_13 : i32
    %23 = arith.extui %22 : i1 to i32
    %c0_i32_14 = arith.constant 0 : i32
    %24 = arith.cmpi ne, %23, %c0_i32_14 : i32
    scf.if %24 {
      %c0_15 = arith.constant 0 : index
      %c0_16 = arith.constant 0 : index
      %25 = vector.load %arg7[%c0_15, %c0_16] : memref<128x128xf32, #tpu.memory_space<vmem>>, vector<128x128xf32>
      %c0_17 = arith.constant 0 : index
      %c0_18 = arith.constant 0 : index
      %26 = vector.load %arg6[%c0_17, %c0_18] : memref<128x128xf32, #tpu.memory_space<vmem>>, vector<128x128xf32>
      tpu.vector_store %arg6[%c0_17, %c0_18], %25 {strides = array<i32>} : memref<128x128xf32, #tpu.memory_space<vmem>>, vector<128x128xf32>,
    } else {
    }
    return
  }
  func.func @transform_0(%arg0: i32, %arg1: i32) -> (i32, i32) {
    %c0_i32 = arith.constant 0 : i32
    return %arg0, %arg1 : i32, i32
  }
  func.func @transform_1(%arg0: i32, %arg1: i32) -> (i32, i32) {
    %c0_i32 = arith.constant 0 : i32
    %c0_i32_0 = arith.constant 0 : i32
    return %c0_i32, %arg1 : i32, i32
  }
  func.func @transform_2(%arg0: i32, %arg1: i32) -> (i32, i32) {
    %c0_i32 = arith.constant 0 : i32
    %c0_i32_0 = arith.constant 0 : i32
    return %c0_i32, %arg1 : i32, i32
  }
  func.func @transform_3(%arg0: i32, %arg1: i32) -> (i32, i32) {
    %c0_i32 = arith.constant 0 : i32
    %c0_i32_0 = arith.constant 0 : i32
    return %arg1, %c0_i32 : i32, i32
  }
  func.func @transform_4(%arg0: i32, %arg1: i32) -> (i32, i32) {
    %c0_i32 = arith.constant 0 : i32
    %c0_i32_0 = arith.constant 0 : i32
    return %arg0, %c0_i32 : i32, i32
  }
}

module attributes {stable_mosaic.version = 11 : i64} {
  func.func @_bn_mm_res_kernel(%arg0: i32, %arg1: i32, %arg2: memref<128x128xbf16, #tpu.memory_space<vmem>>, %arg3: memref<1x128xf32, #tpu.memory_space<vmem>>, %arg4: memref<1x128xf32, #tpu.memory_space<vmem>>, %arg5: memref<128x128xbf16, #tpu.memory_space<vmem>>, %arg6: memref<128x128xf32, #tpu.memory_space<vmem>>, %arg7: memref<128x128xf32, #tpu.memory_space<vmem>>, %arg8: memref<128x128xf32, #tpu.memory_space<vmem>>) attributes {dimension_semantics = [#tpu.dimension_semantics<parallel>, #tpu.dimension_semantics<arbitrary>], iteration_bounds = array<i64: 1, 1>, scalar_prefetch = 0 : i64, scratch_operands = 1 : i64, tpu.core_type = #tpu.core_type<tc>, window_params = [{transform_indices = @transform_0, window_bounds = array<i64: 128, 128>}, {transform_indices = @transform_1, window_bounds = array<i64: 1, 128>}, {transform_indices = @transform_2, window_bounds = array<i64: 1, 128>}, {transform_indices = @transform_3, window_bounds = array<i64: 128, 128>}, {transform_indices = @transform_4, window_bounds = array<i64: 128, 128>}, {transform_indices = @transform_5, window_bounds = array<i64: 128, 128>}]} {
    %c0_i32 = arith.constant 0 : i32
    %0 = arith.cmpi eq, %arg1, %c0_i32 : i32
    %1 = arith.extui %0 : i1 to i32
    %c0_i32_0 = arith.constant 0 : i32
    %2 = arith.cmpi ne, %1, %c0_i32_0 : i32
    scf.if %2 {
      %cst_14 = arith.constant 0.000000e+00 : f32
      %20 = vector.broadcast %cst_14 : f32 to vector<128x128xf32>
      %c0_15 = arith.constant 0 : index
      %c0_16 = arith.constant 0 : index
      %21 = vector.load %arg8[%c0_15, %c0_16] : memref<128x128xf32, #tpu.memory_space<vmem>>, vector<128x128xf32>
      tpu.vector_store %arg8[%c0_15, %c0_16], %20 {strides = array<i32>} : memref<128x128xf32, #tpu.memory_space<vmem>>, vector<128x128xf32>,
    } else {
    }
    %c0 = arith.constant 0 : index
    %c0_1 = arith.constant 0 : index
    %3 = vector.load %arg2[%c0, %c0_1] : memref<128x128xbf16, #tpu.memory_space<vmem>>, vector<128x128xbf16>
    %4 = arith.extf %3 : vector<128x128xbf16> to vector<128x128xf32>
    %c0_2 = arith.constant 0 : index
    %c0_3 = arith.constant 0 : index
    %5 = vector.load %arg3[%c0_2, %c0_3] : memref<1x128xf32, #tpu.memory_space<vmem>>, vector<1x128xf32>
    %6 = vector.broadcast %5 : vector<1x128xf32> to vector<128x128xf32>
    %7 = arith.mulf %4, %6 : vector<128x128xf32>
    %c0_4 = arith.constant 0 : index
    %c0_5 = arith.constant 0 : index
    %8 = vector.load %arg4[%c0_4, %c0_5] : memref<1x128xf32, #tpu.memory_space<vmem>>, vector<1x128xf32>
    %9 = vector.broadcast %8 : vector<1x128xf32> to vector<128x128xf32>
    %10 = arith.addf %7, %9 : vector<128x128xf32>
    %c0_6 = arith.constant 0 : index
    %c0_7 = arith.constant 0 : index
    %11 = vector.load %arg8[%c0_6, %c0_7] : memref<128x128xf32, #tpu.memory_space<vmem>>, vector<128x128xf32>
    %12 = arith.truncf %10 : vector<128x128xf32> to vector<128x128xbf16>
    %c0_8 = arith.constant 0 : index
    %c0_9 = arith.constant 0 : index
    %13 = vector.load %arg5[%c0_8, %c0_9] : memref<128x128xbf16, #tpu.memory_space<vmem>>, vector<128x128xbf16>
    %cst = arith.constant dense<0.000000e+00> : vector<128x128xf32>
    %14 = tpu.matmul %12, %13, %cst {dimension_numbers = #tpu.dot_dimension_numbers<[1], [0], [0], [1], [0, 0, 1, 1], [], []>} : vector<128x128xbf16>, vector<128x128xbf16>, vector<128x128xf32> -> vector<128x128xf32>
    %15 = arith.addf %11, %14 : vector<128x128xf32>
    %c0_10 = arith.constant 0 : index
    %c0_11 = arith.constant 0 : index
    %16 = vector.load %arg8[%c0_10, %c0_11] : memref<128x128xf32, #tpu.memory_space<vmem>>, vector<128x128xf32>
    tpu.vector_store %arg8[%c0_10, %c0_11], %15 {strides = array<i32>} : memref<128x128xf32, #tpu.memory_space<vmem>>, vector<128x128xf32>,
    %c0_i32_12 = arith.constant 0 : i32
    %17 = arith.cmpi eq, %arg1, %c0_i32_12 : i32
    %18 = arith.extui %17 : i1 to i32
    %c0_i32_13 = arith.constant 0 : i32
    %19 = arith.cmpi ne, %18, %c0_i32_13 : i32
    scf.if %19 {
      %c0_14 = arith.constant 0 : index
      %c0_15 = arith.constant 0 : index
      %20 = vector.load %arg8[%c0_14, %c0_15] : memref<128x128xf32, #tpu.memory_space<vmem>>, vector<128x128xf32>
      %21 = math.absf %20 : vector<128x128xf32>
      %cst_16 = arith.constant 1.000000e+00 : f32
      %22 = vector.broadcast %cst_16 : f32 to vector<128x128xf32>
      %23 = arith.addf %22, %21 : vector<128x128xf32>
      %24 = tpu.reciprocal %23 {approx = true} : vector<128x128xf32> -> vector<128x128xf32>
      %25 = arith.mulf %20, %24 : vector<128x128xf32>
      %c0_17 = arith.constant 0 : index
      %c0_18 = arith.constant 0 : index
      %26 = vector.load %arg6[%c0_17, %c0_18] : memref<128x128xf32, #tpu.memory_space<vmem>>, vector<128x128xf32>
      %27 = arith.addf %25, %26 : vector<128x128xf32>
      %c0_19 = arith.constant 0 : index
      %c0_20 = arith.constant 0 : index
      %28 = vector.load %arg7[%c0_19, %c0_20] : memref<128x128xf32, #tpu.memory_space<vmem>>, vector<128x128xf32>
      tpu.vector_store %arg7[%c0_19, %c0_20], %27 {strides = array<i32>} : memref<128x128xf32, #tpu.memory_space<vmem>>, vector<128x128xf32>,
    } else {
    }
    return
  }
  func.func @transform_0(%arg0: i32, %arg1: i32) -> (i32, i32) {
    %c0_i32 = arith.constant 0 : i32
    return %arg0, %arg1 : i32, i32
  }
  func.func @transform_1(%arg0: i32, %arg1: i32) -> (i32, i32) {
    %c0_i32 = arith.constant 0 : i32
    %c0_i32_0 = arith.constant 0 : i32
    return %c0_i32, %arg1 : i32, i32
  }
  func.func @transform_2(%arg0: i32, %arg1: i32) -> (i32, i32) {
    %c0_i32 = arith.constant 0 : i32
    %c0_i32_0 = arith.constant 0 : i32
    return %c0_i32, %arg1 : i32, i32
  }
  func.func @transform_3(%arg0: i32, %arg1: i32) -> (i32, i32) {
    %c0_i32 = arith.constant 0 : i32
    %c0_i32_0 = arith.constant 0 : i32
    return %arg1, %c0_i32 : i32, i32
  }
  func.func @transform_4(%arg0: i32, %arg1: i32) -> (i32, i32) {
    %c0_i32 = arith.constant 0 : i32
    %c0_i32_0 = arith.constant 0 : i32
    return %arg0, %c0_i32 : i32, i32
  }
  func.func @transform_5(%arg0: i32, %arg1: i32) -> (i32, i32) {
    %c0_i32 = arith.constant 0 : i32
    %c0_i32_0 = arith.constant 0 : i32
    return %arg0, %c0_i32 : i32, i32
  }
}

</mosaic_0001>

<bundles_post_ra>
// kernel: preact_bottleneck.4
= control target key start
LH: loop header
LB: loop body
LE: loop exit
PB: predicated region body
PF: predicated region fallthrough
CT: control target
= control target key end

     0   :  { %s927_s3 = inlined_call_operand.vmem [shape: bf16[128,128], index: 3, kind: input, shape index: {}]   ;;  %s928_s0 = inlined_call_operand.vmem [shape: bf16[128,128], index: 0, kind: input, shape index: {}]   ;;  %s929_s1 = inlined_call_operand.vmem [shape: f32[1,128], index: 1, kind: input, shape index: {}]   ;;  %s930_s2 = inlined_call_operand.vmem [shape: f32[1,128], index: 2, kind: input, shape index: {}]   ;;  %s931_s4 = inlined_call_operand.vmem [shape: bf16[128,128], index: 4, kind: output, shape index: {}]  }
   0x1   :  { %v692_v0 = vld [vmem:[%s927_s3] sm:$0xff]   ;;  %v693_v1 = vld [vmem:[%s927_s3 + $0x8] sm:$0xff]   ;;  %v694_v2 = vld [vmem:[%s927_s3 + $0x10] sm:$0xff]  }
   0x2   :  { %644 = vmatprep.subr.bf16.mxu0 %v692_v0  ;;  %676 = vmatprep.subr.bf16.mxu1 %v692_v0  ;;  %v695_v3 = vld [vmem:[%s927_s3 + $0x18] sm:$0xff]   ;;  %v543_v4 = vld [vmem:[%s928_s0] sm:$0xff]   ;;  %v614_v9 = vld [vmem:[%s928_s0 + $0x8] sm:$0xff]  }
   0x3   :  { %645 = vmatpush3.bf16.msra.mxu0 %v692_v0  ;;  %684 = vmatpush3.bf16.msra.mxu1 %v692_v0  ;;  %v775_v5 = vld [vmem:[%s929_s1] ss:$0 sm:$0xff]  ;;  %v544_v6 = vunpack.c.l.bf16 %v543_v4  ;;  %v545_v7 = vunpack.c.h.bf16 %v543_v4  ;;  %v618_v10 = vld [vmem:[%s928_s0 + $0x28] sm:$0xff]   ;;  %v548_v14 = vunpack.c.l.bf16 %v614_v9  ;;  %v549_v15 = vunpack.c.h.bf16 %v614_v9  ;;  %v615_v16 = vld [vmem:[%s928_s0 + $0x10] sm:$0xff]  }
   0x4   :  { %646 = vmatprep.subr.bf16.mxu0 %v693_v1  ;;  %677 = vmatprep.subr.bf16.mxu1 %v693_v1  ;;  %v617_v8 = vld [vmem:[%s928_s0 + $0x20] sm:$0xff]   ;;  %v564_v19 = vunpack.c.l.bf16 %v618_v10  ;;  %v565_v20 = vunpack.c.h.bf16 %v618_v10  ;;  %v552_v25 = vunpack.c.l.bf16 %v615_v16  ;;  %v697_v34 = vld [vmem:[%s927_s3 + $0x28] sm:$0xff]   ;;  %v619_v39 = vld [vmem:[%s928_s0 + $0x30] sm:$0xff]   ;;  %v553_v55 = vunpack.c.h.bf16 %v615_v16 }
   0x5   :  { %v789_v11 = vld [vmem:[%s930_s2] ss:$0 sm:$0xff]  ;;  %v560_v12 = vunpack.c.l.bf16 %v617_v8  ;;  %v561_v13 = vunpack.c.h.bf16 %v617_v8  ;;  %v77_v17 = vmul.f32 %v544_v6, %v775_v5  ;;  %v78_v18 = vmul.f32 %v545_v7, %v775_v5  ;;  %v616_v52 = vld [vmem:[%s928_s0 + $0x18] sm:$0xff]   ;;  %v698_v56 = vld [vmem:[%s927_s3 + $0x30] sm:$0xff]  }
   0x6   :  { %v696_v21 = vld [vmem:[%s927_s3 + $0x20] sm:$0xff]   ;;  %v79_v24 = vmul.f32 %v548_v14, %v775_v5  ;;  %v80_v28 = vmul.f32 %v549_v15, %v775_v5  ;;  %v87_v29 = vmul.f32 %v564_v19, %v775_v5  ;;  %v88_v33 = vmul.f32 %v565_v20, %v775_v5  ;;  %v699_v6 = vld [vmem:[%s927_s3 + $0x38] sm:$0xff]  }
   0x7   :  { %647 = vmatpush3.bf16.msra.mxu0 %v693_v1  ;;  %685 = vmatpush3.bf16.msra.mxu1 %v693_v1  ;;  %v85_v22 = vmul.f32 %v560_v12, %v775_v5  ;;  %v86_v23 = vmul.f32 %v561_v13, %v775_v5  ;;  %v803_v26 = vadd.f32 %v789_v11, %v77_v17  ;;  %v568_v59 = vunpack.c.l.bf16 %v619_v39  ;;  %v620_v10 = vld [vmem:[%s928_s0 + $0x38] sm:$0xff]  }
   0x8   :  { %648 = vmatprep.subr.bf16.mxu0 %v694_v2  ;;  %678 = vmatprep.subr.bf16.mxu1 %v694_v2  ;;  %v806_v27 = vadd.f32 %v789_v11, %v78_v18  ;;  %v817_v32 = vadd.f32 %v789_v11, %v79_v24  ;;  %v826_v37 = vadd.f32 %v789_v11, %v80_v28  ;;  %v569_v61 = vunpack.c.h.bf16 %v619_v39 }
   0x9   :  { %v811_v30 = vadd.f32 %v789_v11, %v85_v22  ;;  %v814_v31 = vadd.f32 %v789_v11, %v86_v23  ;;  %v116_v35 = vand.u32 2147483647, %v803_v26  ;;  %v829_v38 = vadd.f32 %v789_v11, %v87_v29 }
   0xa   :  { %v117_v36 = vand.u32 2147483647, %v806_v27  ;;  %v118_v42 = vand.u32 2147483647, %v817_v32  ;;  %v838_v43 = vadd.f32 %v789_v11, %v88_v33  ;;  %v119_v46 = vand.u32 2147483647, %v826_v37 }
   0xb   :  { %649 = vmatpush3.bf16.msra.mxu0 %v694_v2  ;;  %686 = vmatpush3.bf16.msra.mxu1 %v694_v2  ;;  %v124_v40 = vand.u32 2147483647, %v811_v30  ;;  %v125_v41 = vand.u32 2147483647, %v814_v31  ;;  %v132_v44 = vadd.f32 1.0, %v116_v35  ;;  %v81_v58 = vmul.f32 %v552_v25, %v775_v5 }
   0xc   :  { %650 = vmatprep.subr.bf16.mxu0 %v695_v3  ;;  %679 = vmatprep.subr.bf16.mxu1 %v695_v3  ;;  %v133_v45 = vadd.f32 1.0, %v117_v36  ;;  %v126_v47 = vand.u32 2147483647, %v829_v38  ;;  %v134_v50 = vadd.f32 1.0, %v118_v42  ;;  %v127_v51 = vand.u32 2147483647, %v838_v43 }
   0xd   :  { %v140_v48 = vadd.f32 1.0, %v124_v40  ;;  %v141_v49 = vadd.f32 1.0, %v125_v41  ;;  %700 = vrcp.f32 %v132_v44  ;;  %v135_v53 = vadd.f32 1.0, %v119_v46 }
   0xe   :  { %v142_v54 = vadd.f32 1.0, %v126_v47  ;;  %702 = vrcp.f32 %v133_v45  ;;  %v143_v57 = vadd.f32 1.0, %v127_v51  ;;  %v82_v60 = vmul.f32 %v553_v55, %v775_v5 }
   0xf   :  { %651 = vmatpush3.bf16.msra.mxu0 %v695_v3  ;;  %687 = vmatpush3.bf16.msra.mxu1 %v695_v3  ;;  %704 = vrcp.f32 %v140_v48  ;;  %v556_v62 = vunpack.c.l.bf16 %v616_v52  ;;  %v852_v63 = vadd.f32 %v789_v11, %v81_v58  ;;  %v89_v0 = vmul.f32 %v568_v59, %v775_v5 }
  0x10   :  { %652 = vmatprep.subr.bf16.mxu0 %v696_v21  ;;  %680 = vmatprep.subr.bf16.mxu1 %v696_v21  ;;  %706 = vrcp.f32 %v141_v49  ;;  %v557_v1 = vunpack.c.h.bf16 %v616_v52  ;;  %v856_v2 = vadd.f32 %v789_v11, %v82_v60  ;;  %v90_v3 = vmul.f32 %v569_v61, %v775_v5 }
  0x11   :  { %708 = vrcp.f32 %v134_v50  ;;  %v83_v4 = vmul.f32 %v556_v62, %v775_v5  ;;  %v120_v7 = vand.u32 2147483647, %v852_v63  ;;  %v865_v8 = vadd.f32 %v789_v11, %v89_v0 }
  0x12   :  { %710 = vrcp.f32 %v135_v53  ;;  %v84_v9 = vmul.f32 %v557_v1, %v775_v5  ;;  %v121_v12 = vand.u32 2147483647, %v856_v2  ;;  %v873_v13 = vadd.f32 %v789_v11, %v90_v3 }
  0x13   :  { %653 = vmatpush3.bf16.msra.mxu0 %v696_v21  ;;  %688 = vmatpush3.bf16.msra.mxu1 %v696_v21  ;;  %712 = vrcp.f32 %v142_v54  ;;  %v876_v14 = vadd.f32 %v789_v11, %v83_v4  ;;  %v136_v15 = vadd.f32 1.0, %v120_v7  ;;  %v128_v16 = vand.u32 2147483647, %v865_v8 }
  0x14   :  { %654 = vmatprep.subr.bf16.mxu0 %v697_v34  ;;  %681 = vmatprep.subr.bf16.mxu1 %v697_v34  ;;  %714 = vrcp.f32 %v143_v57  ;;  %v880_v17 = vadd.f32 %v789_v11, %v84_v9  ;;  %v137_v18 = vadd.f32 1.0, %v121_v12  ;;  %v129_v19 = vand.u32 2147483647, %v873_v13 }
  0x15   :  { %v122_v20 = vand.u32 2147483647, %v876_v14  ;;  %v572_v21 = vunpack.c.l.bf16 %v620_v10  ;;  %716 = vrcp.f32 %v136_v15  ;;  %v144_v22 = vadd.f32 1.0, %v128_v16 }
  0x16   :  { %v123_v23 = vand.u32 2147483647, %v880_v17  ;;  %v573_v24 = vunpack.c.h.bf16 %v620_v10  ;;  %718 = vrcp.f32 %v137_v18  ;;  %v145_v28 = vadd.f32 1.0, %v129_v19 }
  0x17   :  { %655 = vmatpush3.bf16.msra.mxu0 %v697_v34  ;;  %689 = vmatpush3.bf16.msra.mxu1 %v697_v34  ;;  %v701_v25 = vpop.eup %700  ;;  %v138_v29 = vadd.f32 1.0, %v122_v20  ;;  %v91_v33 = vmul.f32 %v572_v21, %v775_v5  ;;  %720 = vrcp.f32 %v144_v22 }
  0x18   :  { %656 = vmatprep.subr.bf16.mxu0 %v698_v56  ;;  %682 = vmatprep.subr.bf16.mxu1 %v698_v56  ;;  %v703_v34 = vpop.eup %702  ;;  %v164_v35 = vmul.f32 %v701_v25, %v803_v26  ;;  %v139_v36 = vadd.f32 1.0, %v123_v23  ;;  %v92_v39 = vmul.f32 %v573_v24, %v775_v5  ;;  %722 = vrcp.f32 %v145_v28 }
  0x19   :  { %v705_v40 = vpop.eup %704  ;;  %v165_v41 = vmul.f32 %v703_v34, %v806_v27  ;;  %v114_v42 = vadd.f32 %v789_v11, %v91_v33  ;;  %724 = vrcp.f32 %v138_v29 }
  0x1a   :  { %v707_v44 = vpop.eup %706  ;;  %v172_v45 = vmul.f32 %v705_v40, %v811_v30  ;;  %v115_v46 = vadd.f32 %v789_v11, %v92_v39  ;;  %726 = vrcp.f32 %v139_v36 }
  0x1b   :  { %657 = vmatpush3.bf16.msra.mxu0 %v698_v56  ;;  %690 = vmatpush3.bf16.msra.mxu1 %v698_v56  ;;  %v709_v47 = vpop.eup %708  ;;  %v196_v26 = vpack.c.bf16 %v165_v41, %v164_v35  ;;  %v173_v48 = vmul.f32 %v707_v44, %v814_v31  ;;  %v130_v5 = vand.u32 2147483647, %v114_v42 }
  0x1c   :  { %658 = vmatprep.subr.bf16.mxu0 %v699_v6  ;;  %683 = vmatprep.subr.bf16.mxu1 %v699_v6  ;;  %v711_v49 = vpop.eup %710  ;;  %v166_v50 = vmul.f32 %v709_v47, %v817_v32  ;;  %v131_v51 = vand.u32 2147483647, %v115_v46 }
  0x1d   :  { %v713_v27 = vpop.eup %712  ;;  %660 = vmatprep.mubr.bf16.mxu0 %v196_v26  ;;  %v200_v52 = vpack.c.bf16 %v173_v48, %v172_v45  ;;  %v167_v53 = vmul.f32 %v711_v49, %v826_v37  ;;  %v146_v54 = vadd.f32 1.0, %v130_v5 }
  0x1e   :  { %v715_v30 = vpop.eup %714  ;;  %v174_v55 = vmul.f32 %v713_v27, %v829_v38  ;;  %v147_v11 = vadd.f32 1.0, %v131_v51 }
  0x1f   :  { %659 = vmatpush3.bf16.msra.mxu0 %v699_v6  ;;  %691 = vmatpush3.bf16.msra.mxu1 %v699_v6  ;;  %v197_v56 = vpack.c.bf16 %v167_v53, %v166_v50  ;;  %v175_v31 = vmul.f32 %v715_v30, %v838_v43  ;;  %728 = vrcp.f32 %v146_v54  ;;  %v717_v57 = vpop.eup %716 }
  0x20   :  { %668 = vmatprep.mubr.bf16.mxu1 %v200_v52  ;;  %730 = vrcp.f32 %v147_v11  ;;  %v719_v58 = vpop.eup %718  ;;  %v168_v59 = vmul.f32 %v717_v57, %v852_v63 }
  0x21   :  { %v201_v32 = vpack.c.bf16 %v175_v31, %v174_v55  ;;  %v721_v60 = vpop.eup %720  ;;  %v169_v37 = vmul.f32 %v719_v58, %v856_v2 }
  0x22   :  { %661 = vmatmul.mubr.bf16.vlgmr.msra.gmra.mrb[0].mxu0 %v197_v56  ;;  %v723_v61 = vpop.eup %722  ;;  %v176_v38 = vmul.f32 %v721_v60, %v865_v8 }
  0x23   :  { %669 = vmatmul.mubr.bf16.vlgmr.msra.gmra.mrb[0].mxu1 %v201_v32  ;;  %v725_v62 = vpop.eup %724  ;;  %v198_v0 = vpack.c.bf16 %v169_v37, %v168_v59  ;;  %v177_v1 = vmul.f32 %v723_v61, %v873_v13 }
  0x24   :  { %v727_v43 = vpop.eup %726  ;;  %v170_v3 = vmul.f32 %v725_v62, %v876_v14 }
  0x25   :  { %664 = vmatprep.mubr.bf16.mxu0 %v198_v0  ;;  %v202_v4 = vpack.c.bf16 %v177_v1, %v176_v38  ;;  %v171_v6 = vmul.f32 %v727_v43, %v880_v17 }
  0x27   :  { %672 = vmatprep.mubr.bf16.mxu1 %v202_v4  ;;  %v199_v63 = vpack.c.bf16 %v171_v6, %v170_v3 }
  0x29   :  { %v729_v7 = vpop.eup %728 }
  0x2a   :  { %v731_v9 = vpop.eup %730  ;;  %665 = vmatmul.mubr.bf16.gmra.mrb[4].mxu0 %v199_v63  ;;  %v178_v2 = vmul.f32 %v729_v7, %v114_v42 }
  0x2b   :  { %v179_v10 = vmul.f32 %v731_v9, %v115_v46 }
  0x2d   :  { %v203_v12 = vpack.c.bf16 %v179_v10, %v178_v2 }
  0x2f   :  { %673 = vmatmul.mubr.bf16.gmra.mrb[4].mxu1 %v203_v12 }
  0xf5   :  { %v662_v8 = vpop.f32.mrb[0].mxu0 }
  0xf6   :  { %v302_v15 = vpop.f32.mrb[1].mxu0  ;;  %v670_v16 = vpop.f32.mrb[0].mxu1 }
  0xf7   :  { %v663_v13 = vpop.f32.mrb[2].mxu0  ;;  %v334_v18 = vpop.f32.mrb[1].mxu1 }
  0xf8   :  { %v582_v19 = vpack.c.bf16 %v663_v13, %v662_v8  ;;  %v305_v14 = vpop.f32.mrb[3].mxu0  ;;  %v671_v20 = vpop.f32.mrb[2].mxu1 }
  0xf9   :  { %v577_v21 = vpack.c.bf16 %v305_v14, %v302_v15  ;;  %v602_v17 = vpack.c.bf16 %v671_v20, %v670_v16  ;;  %v337_v22 = vpop.f32.mrb[3].mxu1 }
  0xfa   :  { %621 = vst [vmem:[%s931_s4 + $0x8] sm:$0xff] %v582_v19   ;;  %v597_v23 = vpack.c.bf16 %v337_v22, %v334_v18 }
  0xfb   :  { %578 = vst [vmem:[%s931_s4] sm:$0xff] %v577_v21   ;;  %625 = vst [vmem:[%s931_s4 + $0x28] sm:$0xff] %v602_v17  }
  0xfc   :  { %624 = vst [vmem:[%s931_s4 + $0x20] sm:$0xff] %v597_v23  }
  0xfd   :  { %v666_v24 = vpop.f32.mrb[4].mxu0 }
  0xfe   :  { %v318_v25 = vpop.f32.mrb[5].mxu0 }
  0xff   :  { %v667_v28 = vpop.f32.mrb[6].mxu0 }
 0x100   :  { %v592_v29 = vpack.c.bf16 %v667_v28, %v666_v24  ;;  %v321_v33 = vpop.f32.mrb[7].mxu0 }
 0x101   :  { %v587_v34 = vpack.c.bf16 %v321_v33, %v318_v25 }
 0x102   :  { %v674_v35 = vpop.f32.mrb[4].mxu1  ;;  %623 = vst [vmem:[%s931_s4 + $0x18] sm:$0xff] %v592_v29  }
 0x103   :  { %v350_v36 = vpop.f32.mrb[5].mxu1  ;;  %622 = vst [vmem:[%s931_s4 + $0x10] sm:$0xff] %v587_v34  }
 0x104   :  { %v675_v39 = vpop.f32.mrb[6].mxu1 }
 0x105   :  { %v612_v40 = vpack.c.bf16 %v675_v39, %v674_v35  ;;  %v353_v41 = vpop.f32.mrb[7].mxu1 }
 0x106   :  { %v607_v42 = vpack.c.bf16 %v353_v41, %v350_v36 }
 0x107   :  { %627 = vst [vmem:[%s931_s4 + $0x38] sm:$0xff] %v612_v40  }
 0x108   :  { %626 = vst [vmem:[%s931_s4 + $0x30] sm:$0xff] %v607_v42  }

// kernel: preact_bottleneck.5
= control target key start
LH: loop header
LB: loop body
LE: loop exit
PB: predicated region body
PF: predicated region fallthrough
CT: control target
= control target key end

     0   :  { %s808_s3 = inlined_call_operand.vmem [shape: bf16[128,128], index: 3, kind: input, shape index: {}]   ;;  %s809_s0 = inlined_call_operand.vmem [shape: bf16[128,128], index: 0, kind: input, shape index: {}]   ;;  %s810_s1 = inlined_call_operand.vmem [shape: f32[1,128], index: 1, kind: input, shape index: {}]   ;;  %s811_s2 = inlined_call_operand.vmem [shape: f32[1,128], index: 2, kind: input, shape index: {}]   ;;  %s812_s4 = inlined_call_operand.vmem [shape: f32[128,128], index: 4, kind: output, shape index: {}]  }
   0x1   :  { %v549_v0 = vld [vmem:[%s808_s3] sm:$0xff]   ;;  %v550_v1 = vld [vmem:[%s808_s3 + $0x8] sm:$0xff]   ;;  %v551_v2 = vld [vmem:[%s808_s3 + $0x10] sm:$0xff]  }
   0x2   :  { %501 = vmatprep.subr.bf16.mxu0 %v549_v0  ;;  %533 = vmatprep.subr.bf16.mxu1 %v549_v0  ;;  %v552_v3 = vld [vmem:[%s808_s3 + $0x18] sm:$0xff]   ;;  %v447_v4 = vld [vmem:[%s809_s0] sm:$0xff]   ;;  %v478_v9 = vld [vmem:[%s809_s0 + $0x8] sm:$0xff]  }
   0x3   :  { %502 = vmatpush3.bf16.msra.mxu0 %v549_v0  ;;  %541 = vmatpush3.bf16.msra.mxu1 %v549_v0  ;;  %v632_v5 = vld [vmem:[%s810_s1] ss:$0 sm:$0xff]  ;;  %v448_v6 = vunpack.c.l.bf16 %v447_v4  ;;  %v449_v7 = vunpack.c.h.bf16 %v447_v4  ;;  %v482_v10 = vld [vmem:[%s809_s0 + $0x28] sm:$0xff]   ;;  %v452_v14 = vunpack.c.l.bf16 %v478_v9  ;;  %v453_v15 = vunpack.c.h.bf16 %v478_v9  ;;  %v479_v16 = vld [vmem:[%s809_s0 + $0x10] sm:$0xff]  }
   0x4   :  { %503 = vmatprep.subr.bf16.mxu0 %v550_v1  ;;  %534 = vmatprep.subr.bf16.mxu1 %v550_v1  ;;  %v481_v8 = vld [vmem:[%s809_s0 + $0x20] sm:$0xff]   ;;  %v468_v19 = vunpack.c.l.bf16 %v482_v10  ;;  %v469_v20 = vunpack.c.h.bf16 %v482_v10  ;;  %v456_v25 = vunpack.c.l.bf16 %v479_v16  ;;  %v554_v34 = vld [vmem:[%s808_s3 + $0x28] sm:$0xff]   ;;  %v483_v39 = vld [vmem:[%s809_s0 + $0x30] sm:$0xff]   ;;  %v457_v55 = vunpack.c.h.bf16 %v479_v16 }
   0x5   :  { %v646_v11 = vld [vmem:[%s811_s2] ss:$0 sm:$0xff]  ;;  %v464_v12 = vunpack.c.l.bf16 %v481_v8  ;;  %v465_v13 = vunpack.c.h.bf16 %v481_v8  ;;  %v77_v17 = vmul.f32 %v448_v6, %v632_v5  ;;  %v78_v18 = vmul.f32 %v449_v7, %v632_v5  ;;  %v480_v52 = vld [vmem:[%s809_s0 + $0x18] sm:$0xff]   ;;  %v555_v56 = vld [vmem:[%s808_s3 + $0x30] sm:$0xff]  }
   0x6   :  { %v553_v21 = vld [vmem:[%s808_s3 + $0x20] sm:$0xff]   ;;  %v79_v24 = vmul.f32 %v452_v14, %v632_v5  ;;  %v80_v28 = vmul.f32 %v453_v15, %v632_v5  ;;  %v87_v29 = vmul.f32 %v468_v19, %v632_v5  ;;  %v88_v33 = vmul.f32 %v469_v20, %v632_v5  ;;  %v556_v6 = vld [vmem:[%s808_s3 + $0x38] sm:$0xff]  }
   0x7   :  { %504 = vmatpush3.bf16.msra.mxu0 %v550_v1  ;;  %542 = vmatpush3.bf16.msra.mxu1 %v550_v1  ;;  %v85_v22 = vmul.f32 %v464_v12, %v632_v5  ;;  %v86_v23 = vmul.f32 %v465_v13, %v632_v5  ;;  %v660_v26 = vadd.f32 %v646_v11, %v77_v17  ;;  %v472_v59 = vunpack.c.l.bf16 %v483_v39  ;;  %v484_v10 = vld [vmem:[%s809_s0 + $0x38] sm:$0xff]  }
   0x8   :  { %505 = vmatprep.subr.bf16.mxu0 %v551_v2  ;;  %535 = vmatprep.subr.bf16.mxu1 %v551_v2  ;;  %v663_v27 = vadd.f32 %v646_v11, %v78_v18  ;;  %v674_v32 = vadd.f32 %v646_v11, %v79_v24  ;;  %v683_v37 = vadd.f32 %v646_v11, %v80_v28  ;;  %v473_v61 = vunpack.c.h.bf16 %v483_v39 }
   0x9   :  { %v668_v30 = vadd.f32 %v646_v11, %v85_v22  ;;  %v671_v31 = vadd.f32 %v646_v11, %v86_v23  ;;  %v116_v35 = vand.u32 2147483647, %v660_v26  ;;  %v686_v38 = vadd.f32 %v646_v11, %v87_v29 }
   0xa   :  { %v117_v36 = vand.u32 2147483647, %v663_v27  ;;  %v118_v42 = vand.u32 2147483647, %v674_v32  ;;  %v695_v43 = vadd.f32 %v646_v11, %v88_v33  ;;  %v119_v46 = vand.u32 2147483647, %v683_v37 }
   0xb   :  { %506 = vmatpush3.bf16.msra.mxu0 %v551_v2  ;;  %543 = vmatpush3.bf16.msra.mxu1 %v551_v2  ;;  %v124_v40 = vand.u32 2147483647, %v668_v30  ;;  %v125_v41 = vand.u32 2147483647, %v671_v31  ;;  %v132_v44 = vadd.f32 1.0, %v116_v35  ;;  %v81_v58 = vmul.f32 %v456_v25, %v632_v5 }
   0xc   :  { %507 = vmatprep.subr.bf16.mxu0 %v552_v3  ;;  %536 = vmatprep.subr.bf16.mxu1 %v552_v3  ;;  %v133_v45 = vadd.f32 1.0, %v117_v36  ;;  %v126_v47 = vand.u32 2147483647, %v686_v38  ;;  %v134_v50 = vadd.f32 1.0, %v118_v42  ;;  %v127_v51 = vand.u32 2147483647, %v695_v43 }
   0xd   :  { %v140_v48 = vadd.f32 1.0, %v124_v40  ;;  %v141_v49 = vadd.f32 1.0, %v125_v41  ;;  %557 = vrcp.f32 %v132_v44  ;;  %v135_v53 = vadd.f32 1.0, %v119_v46 }
   0xe   :  { %v142_v54 = vadd.f32 1.0, %v126_v47  ;;  %559 = vrcp.f32 %v133_v45  ;;  %v143_v57 = vadd.f32 1.0, %v127_v51  ;;  %v82_v60 = vmul.f32 %v457_v55, %v632_v5 }
   0xf   :  { %508 = vmatpush3.bf16.msra.mxu0 %v552_v3  ;;  %544 = vmatpush3.bf16.msra.mxu1 %v552_v3  ;;  %561 = vrcp.f32 %v140_v48  ;;  %v460_v62 = vunpack.c.l.bf16 %v480_v52  ;;  %v709_v63 = vadd.f32 %v646_v11, %v81_v58  ;;  %v89_v0 = vmul.f32 %v472_v59, %v632_v5 }
  0x10   :  { %509 = vmatprep.subr.bf16.mxu0 %v553_v21  ;;  %537 = vmatprep.subr.bf16.mxu1 %v553_v21  ;;  %563 = vrcp.f32 %v141_v49  ;;  %v461_v1 = vunpack.c.h.bf16 %v480_v52  ;;  %v713_v2 = vadd.f32 %v646_v11, %v82_v60  ;;  %v90_v3 = vmul.f32 %v473_v61, %v632_v5 }
  0x11   :  { %565 = vrcp.f32 %v134_v50  ;;  %v83_v4 = vmul.f32 %v460_v62, %v632_v5  ;;  %v120_v7 = vand.u32 2147483647, %v709_v63  ;;  %v722_v8 = vadd.f32 %v646_v11, %v89_v0 }
  0x12   :  { %567 = vrcp.f32 %v135_v53  ;;  %v84_v9 = vmul.f32 %v461_v1, %v632_v5  ;;  %v121_v12 = vand.u32 2147483647, %v713_v2  ;;  %v730_v13 = vadd.f32 %v646_v11, %v90_v3 }
  0x13   :  { %510 = vmatpush3.bf16.msra.mxu0 %v553_v21  ;;  %545 = vmatpush3.bf16.msra.mxu1 %v553_v21  ;;  %569 = vrcp.f32 %v142_v54  ;;  %v733_v14 = vadd.f32 %v646_v11, %v83_v4  ;;  %v136_v15 = vadd.f32 1.0, %v120_v7  ;;  %v128_v16 = vand.u32 2147483647, %v722_v8 }
  0x14   :  { %511 = vmatprep.subr.bf16.mxu0 %v554_v34  ;;  %538 = vmatprep.subr.bf16.mxu1 %v554_v34  ;;  %571 = vrcp.f32 %v143_v57  ;;  %v737_v17 = vadd.f32 %v646_v11, %v84_v9  ;;  %v137_v18 = vadd.f32 1.0, %v121_v12  ;;  %v129_v19 = vand.u32 2147483647, %v730_v13 }
  0x15   :  { %v122_v20 = vand.u32 2147483647, %v733_v14  ;;  %v476_v21 = vunpack.c.l.bf16 %v484_v10  ;;  %573 = vrcp.f32 %v136_v15  ;;  %v144_v22 = vadd.f32 1.0, %v128_v16 }
  0x16   :  { %v123_v23 = vand.u32 2147483647, %v737_v17  ;;  %v477_v24 = vunpack.c.h.bf16 %v484_v10  ;;  %575 = vrcp.f32 %v137_v18  ;;  %v145_v28 = vadd.f32 1.0, %v129_v19 }
  0x17   :  { %512 = vmatpush3.bf16.msra.mxu0 %v554_v34  ;;  %546 = vmatpush3.bf16.msra.mxu1 %v554_v34  ;;  %v558_v25 = vpop.eup %557  ;;  %v138_v29 = vadd.f32 1.0, %v122_v20  ;;  %v91_v33 = vmul.f32 %v476_v21, %v632_v5  ;;  %577 = vrcp.f32 %v144_v22 }
  0x18   :  { %513 = vmatprep.subr.bf16.mxu0 %v555_v56  ;;  %539 = vmatprep.subr.bf16.mxu1 %v555_v56  ;;  %v560_v34 = vpop.eup %559  ;;  %v164_v35 = vmul.f32 %v558_v25, %v660_v26  ;;  %v139_v36 = vadd.f32 1.0, %v123_v23  ;;  %v92_v39 = vmul.f32 %v477_v24, %v632_v5  ;;  %579 = vrcp.f32 %v145_v28 }
  0x19   :  { %v562_v40 = vpop.eup %561  ;;  %v165_v41 = vmul.f32 %v560_v34, %v663_v27  ;;  %v114_v42 = vadd.f32 %v646_v11, %v91_v33  ;;  %581 = vrcp.f32 %v138_v29 }
  0x1a   :  { %v564_v44 = vpop.eup %563  ;;  %v172_v45 = vmul.f32 %v562_v40, %v668_v30  ;;  %v115_v46 = vadd.f32 %v646_v11, %v92_v39  ;;  %583 = vrcp.f32 %v139_v36 }
  0x1b   :  { %514 = vmatpush3.bf16.msra.mxu0 %v555_v56  ;;  %547 = vmatpush3.bf16.msra.mxu1 %v555_v56  ;;  %v566_v47 = vpop.eup %565  ;;  %v196_v26 = vpack.c.bf16 %v165_v41, %v164_v35  ;;  %v173_v48 = vmul.f32 %v564_v44, %v671_v31  ;;  %v130_v5 = vand.u32 2147483647, %v114_v42 }
  0x1c   :  { %515 = vmatprep.subr.bf16.mxu0 %v556_v6  ;;  %540 = vmatprep.subr.bf16.mxu1 %v556_v6  ;;  %v568_v49 = vpop.eup %567  ;;  %v166_v50 = vmul.f32 %v566_v47, %v674_v32  ;;  %v131_v51 = vand.u32 2147483647, %v115_v46 }
  0x1d   :  { %v570_v27 = vpop.eup %569  ;;  %517 = vmatprep.mubr.bf16.mxu0 %v196_v26  ;;  %v200_v52 = vpack.c.bf16 %v173_v48, %v172_v45  ;;  %v167_v53 = vmul.f32 %v568_v49, %v683_v37  ;;  %v146_v54 = vadd.f32 1.0, %v130_v5 }
  0x1e   :  { %v572_v30 = vpop.eup %571  ;;  %v174_v55 = vmul.f32 %v570_v27, %v686_v38  ;;  %v147_v11 = vadd.f32 1.0, %v131_v51 }
  0x1f   :  { %516 = vmatpush3.bf16.msra.mxu0 %v556_v6  ;;  %548 = vmatpush3.bf16.msra.mxu1 %v556_v6  ;;  %v197_v56 = vpack.c.bf16 %v167_v53, %v166_v50  ;;  %v175_v31 = vmul.f32 %v572_v30, %v695_v43  ;;  %585 = vrcp.f32 %v146_v54  ;;  %v574_v57 = vpop.eup %573 }
  0x20   :  { %525 = vmatprep.mubr.bf16.mxu1 %v200_v52  ;;  %587 = vrcp.f32 %v147_v11  ;;  %v576_v58 = vpop.eup %575  ;;  %v168_v59 = vmul.f32 %v574_v57, %v709_v63 }
  0x21   :  { %v201_v32 = vpack.c.bf16 %v175_v31, %v174_v55  ;;  %v578_v60 = vpop.eup %577  ;;  %v169_v37 = vmul.f32 %v576_v58, %v713_v2 }
  0x22   :  { %518 = vmatmul.mubr.bf16.vlgmr.msra.gmra.mrb[0].mxu0 %v197_v56  ;;  %v580_v61 = vpop.eup %579  ;;  %v176_v38 = vmul.f32 %v578_v60, %v722_v8 }
  0x23   :  { %526 = vmatmul.mubr.bf16.vlgmr.msra.gmra.mrb[0].mxu1 %v201_v32  ;;  %v582_v62 = vpop.eup %581  ;;  %v198_v0 = vpack.c.bf16 %v169_v37, %v168_v59  ;;  %v177_v1 = vmul.f32 %v580_v61, %v730_v13 }
  0x24   :  { %v584_v43 = vpop.eup %583  ;;  %v170_v3 = vmul.f32 %v582_v62, %v733_v14 }
  0x25   :  { %521 = vmatprep.mubr.bf16.mxu0 %v198_v0  ;;  %v202_v4 = vpack.c.bf16 %v177_v1, %v176_v38  ;;  %v171_v6 = vmul.f32 %v584_v43, %v737_v17 }
  0x27   :  { %529 = vmatprep.mubr.bf16.mxu1 %v202_v4  ;;  %v199_v63 = vpack.c.bf16 %v171_v6, %v170_v3 }
  0x29   :  { %v586_v7 = vpop.eup %585 }
  0x2a   :  { %v588_v9 = vpop.eup %587  ;;  %522 = vmatmul.mubr.bf16.gmra.mrb[4].mxu0 %v199_v63  ;;  %v178_v2 = vmul.f32 %v586_v7, %v114_v42 }
  0x2b   :  { %v179_v10 = vmul.f32 %v588_v9, %v115_v46 }
  0x2d   :  { %v203_v12 = vpack.c.bf16 %v179_v10, %v178_v2 }
  0x2f   :  { %530 = vmatmul.mubr.bf16.gmra.mrb[4].mxu1 %v203_v12 }
  0xf5   :  { %v519_v8 = vpop.f32.mrb[0].mxu0 }
  0xf6   :  { %418 = vst [vmem:[%s812_s4 + $0x10] sm:$0xff] %v519_v8  ;;  %v302_v13 = vpop.f32.mrb[1].mxu0  ;;  %v527_v14 = vpop.f32.mrb[0].mxu1 }
  0xf7   :  { %416 = vst [vmem:[%s812_s4] sm:$0xff] %v302_v13  ;;  %v520_v15 = vpop.f32.mrb[2].mxu0  ;;  %426 = vst [vmem:[%s812_s4 + $0x50] sm:$0xff] %v527_v14  ;;  %v334_v16 = vpop.f32.mrb[1].mxu1 }
  0xf8   :  { %419 = vst [vmem:[%s812_s4 + $0x18] sm:$0xff] %v520_v15  ;;  %v305_v17 = vpop.f32.mrb[3].mxu0  ;;  %424 = vst [vmem:[%s812_s4 + $0x40] sm:$0xff] %v334_v16  ;;  %v528_v18 = vpop.f32.mrb[2].mxu1 }
  0xf9   :  { %417 = vst [vmem:[%s812_s4 + $0x8] sm:$0xff] %v305_v17  ;;  %427 = vst [vmem:[%s812_s4 + $0x58] sm:$0xff] %v528_v18  ;;  %v337_v19 = vpop.f32.mrb[3].mxu1 }
  0xfa   :  { %425 = vst [vmem:[%s812_s4 + $0x48] sm:$0xff] %v337_v19 }
  0xfd   :  { %v523_v20 = vpop.f32.mrb[4].mxu0 }
  0xfe   :  { %422 = vst [vmem:[%s812_s4 + $0x30] sm:$0xff] %v523_v20  ;;  %v318_v21 = vpop.f32.mrb[5].mxu0 }
  0xff   :  { %420 = vst [vmem:[%s812_s4 + $0x20] sm:$0xff] %v318_v21  ;;  %v524_v22 = vpop.f32.mrb[6].mxu0 }
 0x100   :  { %423 = vst [vmem:[%s812_s4 + $0x38] sm:$0xff] %v524_v22  ;;  %v321_v23 = vpop.f32.mrb[7].mxu0 }
 0x101   :  { %421 = vst [vmem:[%s812_s4 + $0x28] sm:$0xff] %v321_v23 }
 0x102   :  { %v531_v24 = vpop.f32.mrb[4].mxu1 }
 0x103   :  { %430 = vst [vmem:[%s812_s4 + $0x70] sm:$0xff] %v531_v24  ;;  %v350_v25 = vpop.f32.mrb[5].mxu1 }
 0x104   :  { %428 = vst [vmem:[%s812_s4 + $0x60] sm:$0xff] %v350_v25  ;;  %v532_v28 = vpop.f32.mrb[6].mxu1 }
 0x105   :  { %431 = vst [vmem:[%s812_s4 + $0x78] sm:$0xff] %v532_v28  ;;  %v353_v29 = vpop.f32.mrb[7].mxu1 }
 0x106   :  { %429 = vst [vmem:[%s812_s4 + $0x68] sm:$0xff] %v353_v29 }

// kernel: preact_bottleneck.7
= control target key start
LH: loop header
LB: loop body
LE: loop exit
PB: predicated region body
PF: predicated region fallthrough
CT: control target
= control target key end

     0   :  { %s907_s0 = inlined_call_operand.vmem [shape: bf16[128,128], index: 0, kind: input, shape index: {}]   ;;  %s908_s1 = inlined_call_operand.vmem [shape: f32[1,128], index: 1, kind: input, shape index: {}]   ;;  %s909_s2 = inlined_call_operand.vmem [shape: f32[1,128], index: 2, kind: input, shape index: {}]   ;;  %s910_s3 = inlined_call_operand.vmem [shape: bf16[128,128], index: 3, kind: input, shape index: {}]   ;;  %s911_s4 = inlined_call_operand.vmem [shape: f32[128,128], index: 4, kind: input, shape index: {}]   ;;  %s912_s5 = inlined_call_operand.hbm [shape: f32[128,128], index: 5, kind: output, shape index: {}]  }
   0x1   :  { %v600_v0 = vld [vmem:[%s910_s3] sm:$0xff]   ;;  %v601_v1 = vld [vmem:[%s910_s3 + $0x8] sm:$0xff]   ;;  %v602_v2 = vld [vmem:[%s910_s3 + $0x10] sm:$0xff]  }
   0x2   :  { %549 = vmatprep.subr.bf16.mxu0 %v600_v0  ;;  %581 = vmatprep.subr.bf16.mxu1 %v600_v0  ;;  %v603_v3 = vld [vmem:[%s910_s3 + $0x18] sm:$0xff]   ;;  %v495_v4 = vld [vmem:[%s907_s0] sm:$0xff]  }
   0x3   :  { %550 = vmatpush3.bf16.msra.mxu0 %v600_v0  ;;  %589 = vmatpush3.bf16.msra.mxu1 %v600_v0  ;;  %v715_v5 = vld [vmem:[%s908_s1] ss:$0 sm:$0xff]  ;;  %v496_v6 = vunpack.c.l.bf16 %v495_v4  ;;  %v497_v7 = vunpack.c.h.bf16 %v495_v4 }
   0x4   :  { %551 = vmatprep.subr.bf16.mxu0 %v601_v1  ;;  %582 = vmatprep.subr.bf16.mxu1 %v601_v1  ;;  %v529_v8 = vld [vmem:[%s907_s0 + $0x20] sm:$0xff]  }
   0x5   :  { %v723_v9 = vld [vmem:[%s909_s2] ss:$0 sm:$0xff]  ;;  %v512_v10 = vunpack.c.l.bf16 %v529_v8  ;;  %v513_v11 = vunpack.c.h.bf16 %v529_v8  ;;  %v81_v12 = vmul.f32 %v496_v6, %v715_v5  ;;  %v82_v13 = vmul.f32 %v497_v7, %v715_v5 }
   0x7   :  { %552 = vmatpush3.bf16.msra.mxu0 %v601_v1  ;;  %590 = vmatpush3.bf16.msra.mxu1 %v601_v1 }
   0x8   :  { %553 = vmatprep.subr.bf16.mxu0 %v602_v2  ;;  %583 = vmatprep.subr.bf16.mxu1 %v602_v2 }
   0xb   :  { %554 = vmatpush3.bf16.msra.mxu0 %v602_v2  ;;  %591 = vmatpush3.bf16.msra.mxu1 %v602_v2 }
   0xc   :  { %10 = vsyncpa [#allocation4], 0  ;;  %555 = vmatprep.subr.bf16.mxu0 %v603_v3  ;;  %584 = vmatprep.subr.bf16.mxu1 %v603_v3  ;;  %v604_v14 = vld [vmem:[%s910_s3 + $0x20] sm:$0xff]   ;;  %v89_v15 = vmul.f32 %v512_v10, %v715_v5  ;;  %v90_v16 = vmul.f32 %v513_v11, %v715_v5  ;;  %v104_v17 = vadd.f32 %v723_v9, %v81_v12  ;;  %v526_v19 = vld [vmem:[%s907_s0 + $0x8] sm:$0xff]  }
   0xd   :  { %v105_v18 = vadd.f32 %v723_v9, %v82_v13  ;;  %v530_v22 = vld [vmem:[%s907_s0 + $0x28] sm:$0xff]   ;;  %v527_v24 = vld [vmem:[%s907_s0 + $0x10] sm:$0xff]   ;;  %v500_v27 = vunpack.c.l.bf16 %v526_v19  ;;  %v501_v29 = vunpack.c.h.bf16 %v526_v19  ;;  %v528_v42 = vld [vmem:[%s907_s0 + $0x18] sm:$0xff]  }
   0xe   :  { %v112_v20 = vadd.f32 %v723_v9, %v89_v15  ;;  %v113_v21 = vadd.f32 %v723_v9, %v90_v16  ;;  %v605_v25 = vld [vmem:[%s910_s3 + $0x28] sm:$0xff]   ;;  %v531_v28 = vld [vmem:[%s907_s0 + $0x30] sm:$0xff]   ;;  %v516_v30 = vunpack.c.l.bf16 %v530_v22  ;;  %v517_v31 = vunpack.c.h.bf16 %v530_v22  ;;  %v532_v46 = vld [vmem:[%s907_s0 + $0x38] sm:$0xff]  }
   0xf   :  { %556 = vmatpush3.bf16.msra.mxu0 %v603_v3  ;;  %592 = vmatpush3.bf16.msra.mxu1 %v603_v3  ;;  %v136_v23 = vpack.c.bf16 %v105_v18, %v104_v17  ;;  %v504_v32 = vunpack.c.l.bf16 %v527_v24  ;;  %v505_v33 = vunpack.c.h.bf16 %v527_v24  ;;  %v520_v34 = vunpack.c.l.bf16 %v531_v28  ;;  %v606_v36 = vld [vmem:[%s910_s3 + $0x30] sm:$0xff]   ;;  %v607_v47 = vld [vmem:[%s910_s3 + $0x38] sm:$0xff]   ;;  %s664_s3 = smov [#allocation3]  }
  0x10   :  { %557 = vmatprep.subr.bf16.mxu0 %v604_v14  ;;  %585 = vmatprep.subr.bf16.mxu1 %v604_v14  ;;  %v140_v26 = vpack.c.bf16 %v113_v21, %v112_v20  ;;  %v521_v35 = vunpack.c.h.bf16 %v531_v28  ;;  %v83_v37 = vmul.f32 %v500_v27, %v715_v5  ;;  %v84_v38 = vmul.f32 %v501_v29, %v715_v5  ;;  %s473_s27 = sshll.u32 %s664_s3, 4  ;;  %s474_s27 = int_to_ptr.vmem [resolvable:$true] %s473_s27 }
  0x11   :  { %565 = vmatprep.mubr.bf16.mxu0 %v136_v23  ;;  %v91_v39 = vmul.f32 %v516_v30, %v715_v5  ;;  %v92_v40 = vmul.f32 %v517_v31, %v715_v5  ;;  %v85_v41 = vmul.f32 %v504_v32, %v715_v5  ;;  %v86_v43 = vmul.f32 %v505_v33, %v715_v5  ;;  %s640_s30 = scalar_lea.vmem %s474_s27, 2048  ;;  %p645_p1 = scmp.lt.s32.totalorder %s474_s27, %s474_s27 }
  0x12   :  { %573 = vmatprep.mubr.bf16.mxu1 %v140_v26  ;;  %v93_v44 = vmul.f32 %v520_v34, %v715_v5  ;;  %v94_v45 = vmul.f32 %v521_v35, %v715_v5  ;;  %v106_v48 = vadd.f32 %v723_v9, %v83_v37  ;;  %v107_v49 = vadd.f32 %v723_v9, %v84_v38  ;;  %p641_p0 = scmp.ne.s32.totalorder %s474_s27, %s640_s30  ;;  %p646_p2 = scmp.lt.s32.totalorder %s640_s30, %s640_s30 }
  0x13   :  { %558 = vmatpush3.bf16.msra.mxu0 %v604_v14  ;;  %593 = vmatpush3.bf16.msra.mxu1 %v604_v14  ;;  %v114_v50 = vadd.f32 %v723_v9, %v91_v39  ;;  %v115_v51 = vadd.f32 %v723_v9, %v92_v40  ;;  %v508_v52 = vunpack.c.l.bf16 %v528_v42  ;;  %v108_v53 = vadd.f32 %v723_v9, %v85_v41 }
  0x14   :  { %559 = vmatprep.subr.bf16.mxu0 %v605_v25  ;;  %586 = vmatprep.subr.bf16.mxu1 %v605_v25  ;;  %v509_v54 = vunpack.c.h.bf16 %v528_v42  ;;  %v524_v55 = vunpack.c.l.bf16 %v532_v46  ;;  %v525_v56 = vunpack.c.h.bf16 %v532_v46  ;;  %v109_v57 = vadd.f32 %v723_v9, %v86_v43  ;;  %p647_p3 = por %p646_p2, %p645_p1 }
  0x15   :  { %v116_v58 = vadd.f32 %v723_v9, %v93_v44  ;;  %v117_v59 = vadd.f32 %v723_v9, %v94_v45  ;;  %v137_v60 = vpack.c.bf16 %v107_v49, %v106_v48  ;;  %v87_v61 = vmul.f32 %v508_v52, %v715_v5 }
  0x16   :  { %v141_v62 = vpack.c.bf16 %v115_v51, %v114_v50  ;;  %v88_v63 = vmul.f32 %v509_v54, %v715_v5  ;;  %v95_v0 = vmul.f32 %v524_v55, %v715_v5  ;;  %v96_v1 = vmul.f32 %v525_v56, %v715_v5  ;;  %p648_p4 = pnand %p647_p3, %p641_p0 }
  0x17   :  { %560 = vmatpush3.bf16.msra.mxu0 %v605_v25  ;;  %594 = vmatpush3.bf16.msra.mxu1 %v605_v25  ;;  %v138_v2 = vpack.c.bf16 %v109_v57, %v108_v53  ;;  %v142_v3 = vpack.c.bf16 %v117_v59, %v116_v58  ;;  %v110_v4 = vadd.f32 %v723_v9, %v87_v61  ;;  %v422_v57 = vld [vmem:[%s911_s4 + $0x10] sm:$0xff] }
  0x18   :  { %561 = vmatprep.subr.bf16.mxu0 %v606_v36  ;;  %587 = vmatprep.subr.bf16.mxu1 %v606_v36  ;;  %v111_v6 = vadd.f32 %v723_v9, %v88_v63  ;;  %v118_v7 = vadd.f32 %v723_v9, %v95_v0  ;;  %v119_v8 = vadd.f32 %v723_v9, %v96_v1  ;;  %v430_v61 = vld [vmem:[%s911_s4 + $0x50] sm:$0xff]  ;;  %v420_v1 = vld [vmem:[%s911_s4] sm:$0xff] }
  0x1a   :  { %v139_v10 = vpack.c.bf16 %v111_v6, %v110_v4  ;;  %v143_v11 = vpack.c.bf16 %v119_v8, %v118_v7  ;;  %v428_v6 = vld [vmem:[%s911_s4 + $0x40] sm:$0xff] }
  0x1b   :  { %562 = vmatpush3.bf16.msra.mxu0 %v606_v36  ;;  %595 = vmatpush3.bf16.msra.mxu1 %v606_v36 }
  0x1c   :  { %563 = vmatprep.subr.bf16.mxu0 %v607_v47  ;;  %588 = vmatprep.subr.bf16.mxu1 %v607_v47 }
  0x1f   :  { %564 = vmatpush3.bf16.msra.mxu0 %v607_v47  ;;  %596 = vmatpush3.bf16.msra.mxu1 %v607_v47 }
  0x22   :  { %566 = vmatmul.mubr.bf16.vlgmr.msra.gmra.mrb[0].mxu0 %v137_v60  ;;  %574 = vmatmul.mubr.bf16.vlgmr.msra.gmra.mrb[0].mxu1 %v141_v62 }
  0x23   :  { %569 = vmatprep.mubr.bf16.mxu0 %v138_v2  ;;  %577 = vmatprep.mubr.bf16.mxu1 %v142_v3 }
  0x2a   :  { %570 = vmatmul.mubr.bf16.gmra.mrb[4].mxu0 %v139_v10  ;;  %578 = vmatmul.mubr.bf16.gmra.mrb[4].mxu1 %v143_v11  ;;  %v423_v11 = vld [vmem:[%s911_s4 + $0x18] sm:$0xff] }
  0xf5   :  { %v567_v5 = vpop.f32.mrb[0].mxu0  ;;  %v787_v12 = vpop.f32.mrb[0].mxu1 }
  0xf6   :  { %v358_v13 = vand.u32 2147483647, %v567_v5  ;;  %v366_v14 = vand.u32 2147483647, %v787_v12  ;;  %v790_v15 = vpop.f32.mrb[1].mxu0  ;;  %v792_v16 = vpop.f32.mrb[1].mxu1 }
  0xf7   :  { %v356_v17 = vand.u32 2147483647, %v790_v15  ;;  %v364_v9 = vand.u32 2147483647, %v792_v16  ;;  %v796_v18 = vpop.f32.mrb[2].mxu0  ;;  %v798_v19 = vpop.f32.mrb[2].mxu1 }
  0xf8   :  { %v374_v20 = vadd.f32 1.0, %v358_v13  ;;  %v382_v21 = vadd.f32 1.0, %v366_v14  ;;  %v359_v22 = vand.u32 2147483647, %v796_v18  ;;  %v367_v23 = vand.u32 2147483647, %v798_v19 }
  0xf9   :  { %v372_v24 = vadd.f32 1.0, %v356_v17  ;;  %v380_v25 = vadd.f32 1.0, %v364_v9  ;;  %v802_v26 = vpop.f32.mrb[3].mxu0  ;;  %v804_v27 = vpop.f32.mrb[3].mxu1  ;;  %v431_v14 = vld [vmem:[%s911_s4 + $0x58] sm:$0xff]  ;;  %v421_v9 = vld [vmem:[%s911_s4 + $0x8] sm:$0xff] }
  0xfa   :  { %608 = vrcp.f32 %v374_v20  ;;  %v375_v28 = vadd.f32 1.0, %v359_v22  ;;  %v357_v29 = vand.u32 2147483647, %v802_v26  ;;  %v383_v30 = vadd.f32 1.0, %v367_v23 }
  0xfb   :  { %610 = vrcp.f32 %v382_v21  ;;  %v365_v31 = vand.u32 2147483647, %v804_v27 }
  0xfc   :  { %612 = vrcp.f32 %v372_v24  ;;  %v373_v32 = vadd.f32 1.0, %v357_v29 }
  0xfd   :  { %614 = vrcp.f32 %v380_v25  ;;  %v381_v33 = vadd.f32 1.0, %v365_v31  ;;  %v808_v34 = vpop.f32.mrb[4].mxu0  ;;  %v810_v35 = vpop.f32.mrb[4].mxu1 }
  0xfe   :  { %616 = vrcp.f32 %v375_v28  ;;  %v362_v36 = vand.u32 2147483647, %v808_v34  ;;  %v370_v37 = vand.u32 2147483647, %v810_v35  ;;  %v814_v38 = vpop.f32.mrb[5].mxu0  ;;  %v816_v39 = vpop.f32.mrb[5].mxu1 }
  0xff   :  { %618 = vrcp.f32 %v383_v30  ;;  %v360_v40 = vand.u32 2147483647, %v814_v38  ;;  %v368_v41 = vand.u32 2147483647, %v816_v39  ;;  %v820_v42 = vpop.f32.mrb[6].mxu0  ;;  %v822_v43 = vpop.f32.mrb[6].mxu1 }
 0x100   :  { %620 = vrcp.f32 %v373_v32  ;;  %v378_v44 = vadd.f32 1.0, %v362_v36  ;;  %v386_v45 = vadd.f32 1.0, %v370_v37  ;;  %v363_v46 = vand.u32 2147483647, %v820_v42  ;;  %v825_v47 = vpop.f32.mrb[7].mxu0  ;;  %v827_v48 = vpop.f32.mrb[7].mxu1 }
 0x101   :  { %622 = vrcp.f32 %v381_v33  ;;  %v376_v49 = vadd.f32 1.0, %v360_v40  ;;  %v384_v50 = vadd.f32 1.0, %v368_v41  ;;  %v371_v51 = vand.u32 2147483647, %v822_v43 }
 0x102   :  { %624 = vrcp.f32 %v378_v44  ;;  %v379_v52 = vadd.f32 1.0, %v363_v46  ;;  %v361_v53 = vand.u32 2147483647, %v825_v47  ;;  %v369_v54 = vand.u32 2147483647, %v827_v48 }
 0x103   :  { %626 = vrcp.f32 %v386_v45  ;;  %v387_v55 = vadd.f32 1.0, %v371_v51 }
 0x104   :  { %v609_v56 = vpop.eup %608  ;;  %628 = vrcp.f32 %v376_v49  ;;  %v377_v58 = vadd.f32 1.0, %v361_v53  ;;  %v385_v62 = vadd.f32 1.0, %v369_v54 }
 0x105   :  { %v611_v59 = vpop.eup %610  ;;  %v406_v60 = vmul.f32 %v609_v56, %v567_v5  ;;  %630 = vrcp.f32 %v384_v50  ;;  %v433_v56 = vld [vmem:[%s911_s4 + $0x68] sm:$0xff] }
 0x106   :  { %v613_v63 = vpop.eup %612  ;;  %v414_v0 = vmul.f32 %v611_v59, %v787_v12  ;;  %632 = vrcp.f32 %v379_v52 }
 0x107   :  { %v615_v2 = vpop.eup %614  ;;  %v438_v3 = vadd.f32 %v422_v57, %v406_v60  ;;  %v404_v4 = vmul.f32 %v613_v63, %v790_v15  ;;  %634 = vrcp.f32 %v387_v55 }
 0x108   :  { %v617_v7 = vpop.eup %616  ;;  %v446_v8 = vadd.f32 %v430_v61, %v414_v0  ;;  %v412_v10 = vmul.f32 %v615_v2, %v792_v16  ;;  %636 = vrcp.f32 %v377_v58 }
 0x109   :  { %v619_v5 = vpop.eup %618  ;;  %454 = vst [vmem:[#allocation3 + $0x10] sm:$0xff] %v438_v3  ;;  %v436_v12 = vadd.f32 %v420_v1, %v404_v4  ;;  %v407_v13 = vmul.f32 %v617_v7, %v796_v18  ;;  %638 = vrcp.f32 %v385_v62  ;;  %v429_v18 = vld [vmem:[%s911_s4 + $0x48] sm:$0xff] }
 0x10a   :  { %v621_v15 = vpop.eup %620  ;;  %462 = vst [vmem:[#allocation3 + $0x50] sm:$0xff] %v446_v8  ;;  %v444_v17 = vadd.f32 %v428_v6, %v412_v10  ;;  %v415_v16 = vmul.f32 %v619_v5, %v798_v19  ;;  %v426_v19 = vld [vmem:[%s911_s4 + $0x30] sm:$0xff] }
 0x10b   :  { %v623_v20 = vpop.eup %622  ;;  %452 = vst [vmem:[#allocation3] sm:$0xff] %v436_v12  ;;  %v439_v21 = vadd.f32 %v423_v11, %v407_v13  ;;  %v405_v22 = vmul.f32 %v621_v15, %v802_v26  ;;  %v434_v26 = vld [vmem:[%s911_s4 + $0x70] sm:$0xff] }
 0x10c   :  { %v625_v23 = vpop.eup %624  ;;  %460 = vst [vmem:[#allocation3 + $0x40] sm:$0xff] %v444_v17  ;;  %v447_v24 = vadd.f32 %v431_v14, %v415_v16  ;;  %v413_v25 = vmul.f32 %v623_v20, %v804_v27  ;;  %v424_v27 = vld [vmem:[%s911_s4 + $0x20] sm:$0xff] }
 0x10d   :  { %v627_v28 = vpop.eup %626  ;;  %455 = vst [vmem:[#allocation3 + $0x18] sm:$0xff] %v439_v21  ;;  %v437_v29 = vadd.f32 %v421_v9, %v405_v22  ;;  %v410_v30 = vmul.f32 %v625_v23, %v808_v34  ;;  %v432_v34 = vld [vmem:[%s911_s4 + $0x60] sm:$0xff] }
 0x10e   :  { %v629_v31 = vpop.eup %628  ;;  %463 = vst [vmem:[#allocation3 + $0x58] sm:$0xff] %v447_v24  ;;  %v445_v32 = vadd.f32 %v429_v18, %v413_v25  ;;  %v418_v33 = vmul.f32 %v627_v28, %v810_v35  ;;  %v427_v35 = vld [vmem:[%s911_s4 + $0x38] sm:$0xff] }
 0x10f   :  { %v631_v36 = vpop.eup %630  ;;  %453 = vst [vmem:[#allocation3 + $0x8] sm:$0xff] %v437_v29  ;;  %v442_v37 = vadd.f32 %v426_v19, %v410_v30  ;;  %v408_v40 = vmul.f32 %v629_v31, %v814_v38  ;;  %v435_v38 = vld [vmem:[%s911_s4 + $0x78] sm:$0xff] }
 0x110   :  { %v633_v41 = vpop.eup %632  ;;  %461 = vst [vmem:[#allocation3 + $0x48] sm:$0xff] %v445_v32  ;;  %v450_v44 = vadd.f32 %v434_v26, %v418_v33  ;;  %v416_v45 = vmul.f32 %v631_v36, %v816_v39  ;;  %v425_v39 = vld [vmem:[%s911_s4 + $0x28] sm:$0xff] }
 0x111   :  { %v635_v46 = vpop.eup %634  ;;  %458 = vst [vmem:[#allocation3 + $0x30] sm:$0xff] %v442_v37  ;;  %v440_v49 = vadd.f32 %v424_v27, %v408_v40  ;;  %v411_v50 = vmul.f32 %v633_v41, %v820_v42 }
 0x112   :  { %v637_v51 = vpop.eup %636  ;;  %466 = vst [vmem:[#allocation3 + $0x70] sm:$0xff] %v450_v44  ;;  %v448_v52 = vadd.f32 %v432_v34, %v416_v45  ;;  %v419_v53 = vmul.f32 %v635_v46, %v822_v43 }
 0x113   :  { %v639_v54 = vpop.eup %638  ;;  %456 = vst [vmem:[#allocation3 + $0x20] sm:$0xff] %v440_v49  ;;  %v443_v55 = vadd.f32 %v427_v35, %v411_v50  ;;  %v409_v42 = vmul.f32 %v637_v51, %v825_v47 }
 0x114   :  { %464 = vst [vmem:[#allocation3 + $0x60] sm:$0xff] %v448_v52  ;;  %v451_v57 = vadd.f32 %v435_v38, %v419_v53  ;;  %v417_v58 = vmul.f32 %v639_v54, %v827_v48 }
 0x115   :  { %459 = vst [vmem:[#allocation3 + $0x38] sm:$0xff] %v443_v55  ;;  %v441_v43 = vadd.f32 %v425_v39, %v409_v42 }
 0x116   :  { %467 = vst [vmem:[#allocation3 + $0x78] sm:$0xff] %v451_v57  ;;  %v449_v59 = vadd.f32 %v433_v56, %v417_v58 }
 0x117   :  { %457 = vst [vmem:[#allocation3 + $0x28] sm:$0xff] %v441_v43 }
 0x118   :  { %465 = vst [vmem:[#allocation3 + $0x68] sm:$0xff] %v449_v59 }
 0x119   :  { %651 = shalt.err (!%p648_p4)
}
 0x11a   :  { %s652_s7 = scalar_lea.hbm %s912_s5, 2048 }
 0x11b   :  { %p653_p5 = scmp.ne.s32.totalorder %s912_s5, %s652_s7  ;;  %p656_p6 = scmp.lt.u32.totalorder %s652_s7, %s912_s5 }
 0x11d   :  { %p658_p7 = pnand %p656_p6, %p653_p5 }
 0x11f   :  { %661 = shalt.err (!%p658_p7)
}
 0x120   :  { %s665_s10 = smov 128   ;;  %s666_s11 = smov 8  }
 0x121   :  { %479 = dma.vmem_to_hbm [thread:$0]  %s474_s27, 2048, %s912_s5, [#allocation4], %s665_s10, %s665_s10, %s666_s11  }
 0x122   :  { %662 = dma.done.wait [#allocation4], 2048  }
 0x123   :  { %663 = vsyncadd [#allocation4], 4294965248 }
 0x124   :  { %483 = vsyncpa [#allocation4], 1 }

// kernel: preact_bottleneck.6
= control target key start
LH: loop header
LB: loop body
LE: loop exit
PB: predicated region body
PF: predicated region fallthrough
CT: control target
= control target key end

     0   :  { %s1909_s9 = smov 0   ;;  %s2279_s0 = inlined_call_operand.vmem [shape: bf16[2,10,10,128], index: 0, kind: input, shape index: {}]   ;;  %s2280_s1 = inlined_call_operand.vmem [shape: bf16[9,128,128], index: 1, kind: input, shape index: {}]   ;;  %s2281_s2 = inlined_call_operand.vmem [shape: bf16[2,8,8,128], index: 2, kind: output, shape index: {}]  }
   0x1 LB: > { %s1256_s10 = sadd.s32 4294967295, %s1886_s9   ;;  %p1260_p0 = scmp.ge.s32.totalorder %s1886_s9, 1  ;;  %s1886_s9 = sphi %s1909_s9, %s12_s9  }
   0x2   : > { %p112_p1 = scmp.lt.s32.totalorder %s1886_s9, 3 }
   0x4   : > { %p113_p2 = pnand %p1260_p0, %p112_p1 }
   0x5   : > { %p134_p3 = scmp.lt.s32.totalorder (!%p113_p2), %s1256_s10, 1  ;;  %s1927_s19 = smov (!%p113_p2), 0  }
   0x6   : > { %116 = sbr.rel (%p113_p2) target bundleno = 413 (0x19d), region = 28 }
   0xd   : > { %s2283_s10 = smov (!%p134_p3, %s1256_s10), 1 }
   0xe   : > { %s1777_s11 = smul.u32 80, %s2283_s10  ;;  %s1485_s12 = sshll.u32 %s2283_s10, 5 }
   0xf   : > { %s1920_s15 = scalar_lea.vmem %s2281_s2, %s1485_s12 }
  0x10   : > { %s1925_s18 = scalar_lea.vmem %s2279_s0, %s1777_s11 }
  0x11 LB: >> { %v1796_v0 = vld [vmem:[%s2280_s1 + $0x40] sm:$0xff]   ;;  %v1892_v1 = vmov 0.0   ;;  %v1798_v3 = vld [vmem:[%s2280_s1 + $0x48] sm:$0xff]   ;;  %vm1893_vm0 = vmmov 0   ;;  %v1800_v5 = vld [vmem:[%s2280_s1 + $0x50] sm:$0xff]   ;;  %s1486_s6 = sshll.u32 %s1890_s19, 3  ;;  %s1890_s19 = sphi %s1927_s19, %s150_s19  }
  0x12   : >> { %1568 = vmatprep.subr.bf16.mxu1 %v1892_v1  ;;  %1648 = vmatprep.subr.bf16.mxu0 %v1892_v1  ;;  %v1797_v2 = vld [vmem:[%s2280_s1 + $0x100] sm:$0xff]   ;;  %v1799_v4 = vld [vmem:[%s2280_s1 + $0x108] sm:$0xff]   ;;  %v1801_v6 = vld [vmem:[%s2280_s1 + $0x110] sm:$0xff]   ;;  %s1970_s10 = scalar_lea.vmem %s1925_s18, %s1486_s6 }
  0x13   : >> { %1569 = vmatpush3.bf16.msra.mxu1 %v1796_v0  ;;  %1584 = vmatprep.mubr.msk.bf16.mxu1 %vm1893_vm0, %v1892_v1  ;;  %v1802_v7 = vld [vmem:[%s2280_s1 + $0x58] sm:$0xff]   ;;  %v1804_v9 = vld [vmem:[%s2280_s1 + $0x60] sm:$0xff]   ;;  %v1806_v13 = vld [vmem:[%s2280_s1 + $0x68] sm:$0xff]  }
  0x14   : >> { %1649 = vmatpush3.bf16.msra.mxu0 %v1797_v2  ;;  %1570 = vmatprep.subr.bf16.mxu1 %v1892_v1  ;;  %v1803_v8 = vld [vmem:[%s2280_s1 + $0x118] sm:$0xff]   ;;  %v1805_v10 = vld [vmem:[%s2280_s1 + $0x120] sm:$0xff]   ;;  %v1350_v15 = vld [vmem:[%s1970_s10 + $0x8] sm:$0xf] }
  0x15   : >> { %1650 = vmatprep.subr.bf16.mxu0 %v1892_v1  ;;  %1664 = vmatprep.mubr.msk.bf16.mxu0 %vm1893_vm0, %v1892_v1  ;;  %v1981_v11 = vld [vmem:[%s1970_s10] sm:$0xf]  ;;  %v1984_v12 = vld [vmem:[%s1970_s10 + $0x4] sm:$0x1]  ;;  %v1993_v16 = vld [vmem:[%s1970_s10 + $0xc] sm:$0x1] }
  0x16   : >> { %v1282_v14 = vcombine.low %v1981_v11, %v1984_v12  ;;  %v1807_v17 = vld [vmem:[%s2280_s1 + $0x128] sm:$0xff]   ;;  %v1368_v18 = vcombine.low %v1350_v15, %v1993_v16  ;;  %v1808_v20 = vld [vmem:[%s2280_s1 + $0x70] sm:$0xff]   ;;  %v1810_v23 = vld [vmem:[%s2280_s1 + $0x78] sm:$0xff]  }
  0x17   : >> { %1571 = vmatpush3.bf16.msra.mxu1 %v1798_v3  ;;  %v1809_v22 = vld [vmem:[%s2280_s1 + $0x130] sm:$0xff]   ;;  %v1811_v28 = vld [vmem:[%s2280_s1 + $0x138] sm:$0xff]   ;;  %v1813_v30 = vld [vmem:[%s2280_s1] sm:$0xff]  }
  0x18   : >> { %1651 = vmatpush3.bf16.msra.mxu0 %v1799_v4  ;;  %1572 = vmatprep.subr.bf16.mxu1 %v1892_v1  ;;  %v197_v19 = vshll.u32 %v1282_v14, 16  ;;  %v628_v21 = vshll.u32 %v1368_v18, 16  ;;  %v195_v24 = vshrl.u32 %v1282_v14, 16  ;;  %v626_v26 = vshrl.u32 %v1368_v18, 16  ;;  %v1815_v32 = vld [vmem:[%s2280_s1 + $0x140] sm:$0xff]   ;;  %v1816_v33 = vld [vmem:[%s2280_s1 + $0x8] sm:$0xff]  }
  0x19   : >> { %1652 = vmatprep.subr.bf16.mxu0 %v1892_v1  ;;  %v1817_v34 = vld [vmem:[%s2280_s1 + $0x148] sm:$0xff]   ;;  %v1818_v35 = vld [vmem:[%s2280_s1 + $0x10] sm:$0xff]   ;;  %v1820_v37 = vld [vmem:[%s2280_s1 + $0x18] sm:$0xff]  }
  0x1a   : >> { %v199_v25 = vrot.slane %v197_v19, 1  ;;  %v630_v27 = vrot.slane %v628_v21, 1  ;;  %v1819_v36 = vld [vmem:[%s2280_s1 + $0x150] sm:$0xff]   ;;  %v1821_v38 = vld [vmem:[%s2280_s1 + $0x158] sm:$0xff]   ;;  %v1822_v39 = vld [vmem:[%s2280_s1 + $0x20] sm:$0xff]  }
  0x1b   : >> { %1573 = vmatpush3.bf16.msra.mxu1 %v1800_v5  ;;  %v1823_v40 = vld [vmem:[%s2280_s1 + $0x160] sm:$0xff]   ;;  %v1824_v41 = vld [vmem:[%s2280_s1 + $0x28] sm:$0xff]   ;;  %v1826_v45 = vld [vmem:[%s2280_s1 + $0x30] sm:$0xff]  }
  0x1c   : >> { %1653 = vmatpush3.bf16.msra.mxu0 %v1801_v6  ;;  %1574 = vmatprep.subr.bf16.mxu1 %v1892_v1  ;;  %v200_v29 = vor.u32 %v199_v25, %v195_v24  ;;  %v631_v31 = vor.u32 %v630_v27, %v626_v26  ;;  %v2065_v42 = vld [vmem:[%s1970_s10] sm:$0xe]  ;;  %v1825_v43 = vld [vmem:[%s2280_s1 + $0x168] sm:$0xff]   ;;  %v1827_v46 = vld [vmem:[%s2280_s1 + $0x170] sm:$0xff]  }
  0x1d   : >> { %1654 = vmatprep.subr.bf16.mxu0 %v1892_v1  ;;  %v1315_v44 = vcombine.low %v2065_v42, %v1984_v12  ;;  %v1377_v47 = vld [vmem:[%s1970_s10 + $0x8] sm:$0xe]  ;;  %v1828_v48 = vld [vmem:[%s2280_s1 + $0x38] sm:$0xff]   ;;  %v1830_v51 = vld [vmem:[%s2280_s1 + $0x80] sm:$0xff]  }
  0x1e   : >> { %v1394_v49 = vcombine.low %v1377_v47, %v1993_v16  ;;  %v1829_v50 = vld [vmem:[%s2280_s1 + $0x178] sm:$0xff]   ;;  %v1832_v53 = vld [vmem:[%s2280_s1 + $0x180] sm:$0xff]   ;;  %v1833_v54 = vld [vmem:[%s2280_s1 + $0x88] sm:$0xff]  }
  0x1f   : >> { %1575 = vmatpush3.bf16.msra.mxu1 %v1802_v7  ;;  %v1834_v55 = vld [vmem:[%s2280_s1 + $0x188] sm:$0xff]   ;;  %v1835_v56 = vld [vmem:[%s2280_s1 + $0x90] sm:$0xff]   ;;  %v1837_v58 = vld [vmem:[%s2280_s1 + $0x98] sm:$0xff]   ;;  %v399_v5 = vrot.slane %v1315_v44, 1 }
  0x20   : >> { %1655 = vmatpush3.bf16.msra.mxu0 %v1803_v8  ;;  %1576 = vmatprep.subr.bf16.mxu1 %v1892_v1  ;;  %v743_v52 = vrot.slane %v1394_v49, 1  ;;  %v1836_v57 = vld [vmem:[%s2280_s1 + $0x190] sm:$0xff]   ;;  %v1838_v59 = vld [vmem:[%s2280_s1 + $0x198] sm:$0xff]   ;;  %v1839_v60 = vld [vmem:[%s2280_s1 + $0xa0] sm:$0xff]  }
  0x21   : >> { %1656 = vmatprep.subr.bf16.mxu0 %v1892_v1  ;;  %v1840_v61 = vld [vmem:[%s2280_s1 + $0x1a0] sm:$0xff]   ;;  %v1841_v62 = vld [vmem:[%s2280_s1 + $0xa8] sm:$0xff]   ;;  %v1843_v0 = vld [vmem:[%s2280_s1 + $0xb0] sm:$0xff]  }
  0x22   : >> { %v1842_v63 = vld [vmem:[%s2280_s1 + $0x1a8] sm:$0xff]   ;;  %v1844_v2 = vld [vmem:[%s2280_s1 + $0x1b0] sm:$0xff]   ;;  %v1845_v3 = vld [vmem:[%s2280_s1 + $0xb8] sm:$0xff]  }
  0x23   : >> { %1577 = vmatpush3.bf16.msra.mxu1 %v1804_v9  ;;  %v1846_v4 = vld [vmem:[%s2280_s1 + $0x1b8] sm:$0xff]   ;;  %v1848_v6 = vld [vmem:[%s2280_s1 + $0xc0] sm:$0xff]   ;;  %v1404_v7 = vld [vmem:[%s1970_s10 + $0x10] sm:$0xf] }
  0x24   : >> { %1657 = vmatpush3.bf16.msra.mxu0 %v1805_v10  ;;  %1578 = vmatprep.subr.bf16.mxu1 %v1892_v1  ;;  %v1849_v8 = vld [vmem:[%s2280_s1 + $0x1c0] sm:$0xff]   ;;  %v1850_v9 = vld [vmem:[%s2280_s1 + $0xc8] sm:$0xff]   ;;  %v1853_v12 = vld [vmem:[%s2280_s1 + $0x1d0] sm:$0xff]  }
  0x25   : >> { %1658 = vmatprep.subr.bf16.mxu0 %v1892_v1  ;;  %v1851_v10 = vld [vmem:[%s2280_s1 + $0x1c8] sm:$0xff]   ;;  %v1855_v14 = vld [vmem:[%s2280_s1 + $0x1d8] sm:$0xff]   ;;  %v1856_v15 = vld [vmem:[%s2280_s1 + $0xe0] sm:$0xff]  }
  0x26   : >> { %v1857_v16 = vld [vmem:[%s2280_s1 + $0x1e0] sm:$0xff]   ;;  %v1430_v18 = vld [vmem:[%s1970_s10 + $0x14] sm:$0x1]  ;;  %v1858_v19 = vld [vmem:[%s2280_s1 + $0xe8] sm:$0xff]  }
  0x27   : >> { %1579 = vmatpush3.bf16.msra.mxu1 %v1806_v13  ;;  %v1854_v13 = vld [vmem:[%s2280_s1 + $0xd8] sm:$0xff]   ;;  %v1859_v21 = vld [vmem:[%s2280_s1 + $0x1e8] sm:$0xff]   ;;  %v1861_v24 = vld [vmem:[%s2280_s1 + $0x1f0] sm:$0xff]  }
  0x28   : >> { %1659 = vmatpush3.bf16.msra.mxu0 %v1807_v17  ;;  %1580 = vmatprep.subr.bf16.mxu1 %v1892_v1  ;;  %v1429_v17 = vld [vmem:[%s1970_s10 + $0x10] sm:$0xf]  ;;  %v1862_v25 = vld [vmem:[%s2280_s1 + $0xf8] sm:$0xff]  }
  0x29   : >> { %1660 = vmatprep.subr.bf16.mxu0 %v1892_v1 }
  0x2b   : >> { %1581 = vmatpush3.bf16.msra.mxu1 %v1808_v20  ;;  %v1447_v20 = vcombine.low %v1429_v17, %v1430_v18 }
  0x2c   : >> { %1661 = vmatpush3.bf16.msra.mxu0 %v1809_v22  ;;  %1582 = vmatprep.subr.bf16.mxu1 %v1892_v1  ;;  %v1860_v22 = vld [vmem:[%s2280_s1 + $0xf0] sm:$0xff]  }
  0x2d   : >> { %1662 = vmatprep.subr.bf16.mxu0 %v1892_v1  ;;  %v970_v26 = vshrl.u32 %v1447_v20, 16 }
  0x2f   : >> { %1583 = vmatpush3.bf16.msra.mxu1 %v1810_v23  ;;  %v972_v23 = vshll.u32 %v1447_v20, 16 }
  0x30   : >> { %1663 = vmatpush3.bf16.msra.mxu0 %v1811_v28  ;;  %1588 = vmatprep.subr.bf16.mxu1 %v1892_v1  ;;  %v1863_v28 = vld [vmem:[%s2280_s1 + $0x1f8] sm:$0xff]  }
  0x31   : >> { %1668 = vmatprep.subr.bf16.mxu0 %v1892_v1  ;;  %v974_v27 = vrot.slane %v972_v23, 1 }
  0x32   : >> { %1585 = vmatmul.mubr.bf16.vlgmr.msra.gmra.mrb[0].mxu1 %v200_v29  ;;  %v1325_v29 = vld [vmem:[%s1970_s10 + $0x8] sm:$0xf] }
  0x33   : >> { %1589 = vmatpush3.bf16.msra.mxu1 %v1813_v30  ;;  %1665 = vmatmul.mubr.bf16.vlgmr.msra.gmra.mrb[0].mxu0 %v631_v31  ;;  %v975_v30 = vor.u32 %v974_v27, %v970_v26  ;;  %v1865_v31 = vld [vmem:[%s2280_s1 + $0x200] sm:$0xff]  }
  0x34   : >> { %1669 = vmatpush3.bf16.msra.mxu0 %v1815_v32  ;;  %1590 = vmatprep.subr.bf16.mxu1 %v1892_v1  ;;  %v1866_v32 = vld [vmem:[%s2280_s1 + $0x208] sm:$0xff]  }
  0x35   : >> { %1670 = vmatprep.subr.bf16.mxu0 %v1892_v1  ;;  %1604 = vmatprep.mubr.msk.bf16.mxu1 %vm1893_vm0, %v1892_v1 }
  0x36   : >> { %1684 = vmatprep.mubr.msk.bf16.mxu0 %vm1893_vm0, %v1892_v1 }
  0x37   : >> { %1591 = vmatpush3.bf16.msra.mxu1 %v1816_v33  ;;  %v1867_v33 = vld [vmem:[%s2280_s1 + $0x210] sm:$0xff]  }
  0x38   : >> { %1671 = vmatpush3.bf16.msra.mxu0 %v1817_v34  ;;  %1592 = vmatprep.subr.bf16.mxu1 %v1892_v1  ;;  %v1868_v34 = vld [vmem:[%s2280_s1 + $0x218] sm:$0xff]  }
  0x39   : >> { %1672 = vmatprep.subr.bf16.mxu0 %v1892_v1 }
  0x3b   : >> { %1593 = vmatpush3.bf16.msra.mxu1 %v1818_v35  ;;  %v1869_v35 = vld [vmem:[%s2280_s1 + $0x220] sm:$0xff]  }
  0x3c   : >> { %1673 = vmatpush3.bf16.msra.mxu0 %v1819_v36  ;;  %1594 = vmatprep.subr.bf16.mxu1 %v1892_v1  ;;  %v1870_v36 = vld [vmem:[%s2280_s1 + $0x228] sm:$0xff]  }
  0x3d   : >> { %1674 = vmatprep.subr.bf16.mxu0 %v1892_v1 }
  0x3f   : >> { %1595 = vmatpush3.bf16.msra.mxu1 %v1820_v37  ;;  %v1871_v37 = vld [vmem:[%s2280_s1 + $0x230] sm:$0xff]  }
  0x40   : >> { %1675 = vmatpush3.bf16.msra.mxu0 %v1821_v38  ;;  %1596 = vmatprep.subr.bf16.mxu1 %v1892_v1  ;;  %v1456_v38 = vld [vmem:[%s1970_s10 + $0x10] sm:$0xe]  ;;  %s1482_s10 = sshll.u32 %s1890_s19, 2  ;;  %s150_s19 = sadd.s32 1, %s1890_s19  }
  0x41   : >> { %1676 = vmatprep.subr.bf16.mxu0 %v1892_v1  ;;  %s1184_s27 = scalar_lea.vmem %s1920_s15, %s1482_s10  ;;  %p147_p4 = scmp.ge.s32.totalorder %s150_s19, 8  }
  0x43   : >> { %1597 = vmatpush3.bf16.msra.mxu1 %v1822_v39  ;;  %v1473_v39 = vcombine.low %v1456_v38, %v1430_v18 }
  0x44   : >> { %1677 = vmatpush3.bf16.msra.mxu0 %v1823_v40  ;;  %1598 = vmatprep.subr.bf16.mxu1 %v1892_v1  ;;  %v1872_v40 = vld [vmem:[%s2280_s1 + $0x238] sm:$0xff]  }
  0x45   : >> { %1678 = vmatprep.subr.bf16.mxu0 %v1892_v1 }
  0x47   : >> { %1599 = vmatpush3.bf16.msra.mxu1 %v1824_v41  ;;  %v1087_v41 = vrot.slane %v1473_v39, 1 }
  0x48   : >> { %1679 = vmatpush3.bf16.msra.mxu0 %v1825_v43  ;;  %1600 = vmatprep.subr.bf16.mxu1 %v1892_v1 }
  0x49   : >> { %1680 = vmatprep.subr.bf16.mxu0 %v1892_v1 }
  0x4b   : >> { %1601 = vmatpush3.bf16.msra.mxu1 %v1826_v45 }
  0x4c   : >> { %1681 = vmatpush3.bf16.msra.mxu0 %v1827_v46  ;;  %1602 = vmatprep.subr.bf16.mxu1 %v1892_v1 }
  0x4d   : >> { %1682 = vmatprep.subr.bf16.mxu0 %v1892_v1 }
  0x4f   : >> { %1603 = vmatpush3.bf16.msra.mxu1 %v1828_v48 }
  0x50   : >> { %1683 = vmatpush3.bf16.msra.mxu0 %v1829_v50  ;;  %1608 = vmatprep.subr.bf16.mxu1 %v1892_v1 }
  0x51   : >> { %1688 = vmatprep.subr.bf16.mxu0 %v1892_v1 }
  0x52   : >> { %1605 = vmatmul.mubr.bf16.vlgmr.msra.gmra.mrb[0].mxu1 %v1981_v11  ;;  %v1852_v11 = vld [vmem:[%s2280_s1 + $0xd0] sm:$0xff]  }
  0x53   : >> { %1609 = vmatpush3.bf16.msra.mxu1 %v1830_v51  ;;  %1685 = vmatmul.mubr.bf16.vlgmr.msra.gmra.mrb[0].mxu0 %v743_v52 }
  0x54   : >> { %1689 = vmatpush3.bf16.msra.mxu0 %v1832_v53  ;;  %1610 = vmatprep.subr.bf16.mxu1 %v1892_v1 }
  0x55   : >> { %1690 = vmatprep.subr.bf16.mxu0 %v1892_v1  ;;  %1624 = vmatprep.mubr.msk.bf16.mxu1 %vm1893_vm0, %v1892_v1 }
  0x56   : >> { %1704 = vmatprep.mubr.msk.bf16.mxu0 %vm1893_vm0, %v1892_v1 }
  0x57   : >> { %1611 = vmatpush3.bf16.msra.mxu1 %v1833_v54 }
  0x58   : >> { %1691 = vmatpush3.bf16.msra.mxu0 %v1834_v55  ;;  %1612 = vmatprep.subr.bf16.mxu1 %v1892_v1 }
  0x59   : >> { %1692 = vmatprep.subr.bf16.mxu0 %v1892_v1 }
  0x5b   : >> { %1613 = vmatpush3.bf16.msra.mxu1 %v1835_v56 }
  0x5c   : >> { %1693 = vmatpush3.bf16.msra.mxu0 %v1836_v57  ;;  %1614 = vmatprep.subr.bf16.mxu1 %v1892_v1 }
  0x5d   : >> { %1694 = vmatprep.subr.bf16.mxu0 %v1892_v1 }
  0x5f   : >> { %1615 = vmatpush3.bf16.msra.mxu1 %v1837_v58 }
  0x60   : >> { %1695 = vmatpush3.bf16.msra.mxu0 %v1838_v59  ;;  %1616 = vmatprep.subr.bf16.mxu1 %v1892_v1 }
  0x61   : >> { %1696 = vmatprep.subr.bf16.mxu0 %v1892_v1 }
  0x63   : >> { %1617 = vmatpush3.bf16.msra.mxu1 %v1839_v60 }
  0x64   : >> { %1697 = vmatpush3.bf16.msra.mxu0 %v1840_v61  ;;  %1618 = vmatprep.subr.bf16.mxu1 %v1892_v1 }
  0x65   : >> { %1698 = vmatprep.subr.bf16.mxu0 %v1892_v1 }
  0x67   : >> { %1619 = vmatpush3.bf16.msra.mxu1 %v1841_v62 }
  0x68   : >> { %1699 = vmatpush3.bf16.msra.mxu0 %v1842_v63  ;;  %1620 = vmatprep.subr.bf16.mxu1 %v1892_v1 }
  0x69   : >> { %1700 = vmatprep.subr.bf16.mxu0 %v1892_v1 }
  0x6b   : >> { %1621 = vmatpush3.bf16.msra.mxu1 %v1843_v0 }
  0x6c   : >> { %1701 = vmatpush3.bf16.msra.mxu0 %v1844_v2  ;;  %1622 = vmatprep.subr.bf16.mxu1 %v1892_v1 }
  0x6d   : >> { %1702 = vmatprep.subr.bf16.mxu0 %v1892_v1 }
  0x6f   : >> { %1623 = vmatpush3.bf16.msra.mxu1 %v1845_v3 }
  0x70   : >> { %1703 = vmatpush3.bf16.msra.mxu0 %v1846_v4  ;;  %1628 = vmatprep.subr.bf16.mxu1 %v1892_v1 }
  0x71   : >> { %1708 = vmatprep.subr.bf16.mxu0 %v1892_v1 }
  0x72   : >> { %1625 = vmatmul.mubr.bf16.vlgmr.msra.gmra.mrb[0].mxu1 %v399_v5 }
  0x73   : >> { %1629 = vmatpush3.bf16.msra.mxu1 %v1848_v6  ;;  %1705 = vmatmul.mubr.bf16.vlgmr.msra.gmra.mrb[0].mxu0 %v1404_v7 }
  0x74   : >> { %1709 = vmatpush3.bf16.msra.mxu0 %v1849_v8  ;;  %1630 = vmatprep.subr.bf16.mxu1 %v1892_v1 }
  0x75   : >> { %1710 = vmatprep.subr.bf16.mxu0 %v1892_v1  ;;  %1644 = vmatprep.mubr.msk.bf16.mxu1 %vm1893_vm0, %v1892_v1 }
  0x76   : >> { %1724 = vmatprep.mubr.msk.bf16.mxu0 %vm1893_vm0, %v1892_v1 }
  0x77   : >> { %1631 = vmatpush3.bf16.msra.mxu1 %v1850_v9 }
  0x78   : >> { %1711 = vmatpush3.bf16.msra.mxu0 %v1851_v10  ;;  %1632 = vmatprep.subr.bf16.mxu1 %v1892_v1 }
  0x79   : >> { %1712 = vmatprep.subr.bf16.mxu0 %v1892_v1 }
  0x7b   : >> { %1633 = vmatpush3.bf16.msra.mxu1 %v1852_v11 }
  0x7c   : >> { %1713 = vmatpush3.bf16.msra.mxu0 %v1853_v12  ;;  %1634 = vmatprep.subr.bf16.mxu1 %v1892_v1 }
  0x7d   : >> { %1714 = vmatprep.subr.bf16.mxu0 %v1892_v1 }
  0x7f   : >> { %1635 = vmatpush3.bf16.msra.mxu1 %v1854_v13 }
  0x80   : >> { %1715 = vmatpush3.bf16.msra.mxu0 %v1855_v14  ;;  %1636 = vmatprep.subr.bf16.mxu1 %v1892_v1 }
  0x81   : >> { %1716 = vmatprep.subr.bf16.mxu0 %v1892_v1 }
  0x83   : >> { %1637 = vmatpush3.bf16.msra.mxu1 %v1856_v15 }
  0x84   : >> { %1717 = vmatpush3.bf16.msra.mxu0 %v1857_v16  ;;  %1638 = vmatprep.subr.bf16.mxu1 %v1892_v1 }
  0x85   : >> { %1718 = vmatprep.subr.bf16.mxu0 %v1892_v1 }
  0x87   : >> { %1639 = vmatpush3.bf16.msra.mxu1 %v1858_v19 }
  0x88   : >> { %1719 = vmatpush3.bf16.msra.mxu0 %v1859_v21  ;;  %1640 = vmatprep.subr.bf16.mxu1 %v1892_v1 }
  0x89   : >> { %1720 = vmatprep.subr.bf16.mxu0 %v1892_v1 }
  0x8b   : >> { %1641 = vmatpush3.bf16.msra.mxu1 %v1860_v22 }
  0x8c   : >> { %1721 = vmatpush3.bf16.msra.mxu0 %v1861_v24  ;;  %1642 = vmatprep.subr.bf16.mxu1 %v1892_v1 }
  0x8d   : >> { %1722 = vmatprep.subr.bf16.mxu0 %v1892_v1 }
  0x8f   : >> { %1643 = vmatpush3.bf16.msra.mxu1 %v1862_v25 }
  0x90   : >> { %1723 = vmatpush3.bf16.msra.mxu0 %v1863_v28 }
  0x91   : >> { %1728 = vmatprep.subr.bf16.mxu0 %v1892_v1 }
  0x92   : >> { %1645 = vmatmul.mubr.bf16.vlgmr.msra.gmra.mrb[0].mxu1 %v1325_v29 }
  0x93   : >> { %1725 = vmatmul.mubr.bf16.vlgmr.msra.gmra.mrb[0].mxu0 %v975_v30 }
  0x94   : >> { %1729 = vmatpush3.bf16.msra.mxu0 %v1865_v31  ;;  %1744 = vmatprep.mubr.msk.bf16.mxu0 %vm1893_vm0, %v1892_v1 }
  0x95   : >> { %1730 = vmatprep.subr.bf16.mxu0 %v1892_v1 }
  0x98   : >> { %1731 = vmatpush3.bf16.msra.mxu0 %v1866_v32 }
  0x99   : >> { %1732 = vmatprep.subr.bf16.mxu0 %v1892_v1 }
  0x9c   : >> { %1733 = vmatpush3.bf16.msra.mxu0 %v1867_v33 }
  0x9d   : >> { %1734 = vmatprep.subr.bf16.mxu0 %v1892_v1 }
  0xa0   : >> { %1735 = vmatpush3.bf16.msra.mxu0 %v1868_v34 }
  0xa1   : >> { %1736 = vmatprep.subr.bf16.mxu0 %v1892_v1 }
  0xa4   : >> { %1737 = vmatpush3.bf16.msra.mxu0 %v1869_v35 }
  0xa5   : >> { %1738 = vmatprep.subr.bf16.mxu0 %v1892_v1 }
  0xa8   : >> { %1739 = vmatpush3.bf16.msra.mxu0 %v1870_v36 }
  0xa9   : >> { %1740 = vmatprep.subr.bf16.mxu0 %v1892_v1 }
  0xac   : >> { %1741 = vmatpush3.bf16.msra.mxu0 %v1871_v37 }
  0xad   : >> { %1742 = vmatprep.subr.bf16.mxu0 %v1892_v1 }
  0xb0   : >> { %1743 = vmatpush3.bf16.msra.mxu0 %v1872_v40 }
  0xb3   : >> { %1745 = vmatmul.mubr.bf16.vlgmr.msra.gmra.mrb[0].mxu0 %v1087_v41 }
 0x165   : >> { %v594_v42 = vpop.f32.mrb[0].mxu1 }
 0x166   : >> { %v1646_v43 = vpop.f32.mrb[1].mxu1 }
 0x167   : >> { %v597_v44 = vpop.f32.mrb[2].mxu1 }
 0x168   : >> { %v1647_v45 = vpop.f32.mrb[3].mxu1 }
 0x186   : >> { %v1171_v46 = vpop.f32.mrb[0].mxu0 }
 0x187   : >> { %v1748_v47 = vadd.f32 %v1171_v46, %v594_v42  ;;  %v1746_v48 = vpop.f32.mrb[1].mxu0 }
 0x188   : >> { %v1174_v49 = vpop.f32.mrb[2].mxu0 }
 0x189   : >> { %v1178_v50 = vand.u32 2147483647, %v1748_v47  ;;  %v1747_v51 = vpop.f32.mrb[3].mxu0 }
 0x18b   : >> { %v1179_v52 = vadd.f32 1.0, %v1178_v50 }
 0x18d   : >> { %1874 = vrcp.f32 %v1179_v52 }
 0x196   : > { %149 = sbr.rel (!%p147_p4) target bundleno = 17 (0x11), region = 77 }
 0x197   : >> { %v1875_v53 = vpop.eup %1874 }
 0x198   : >> { %v1181_v1 = vmul.f32 %v1875_v53, %v1748_v47 }
 0x19a   : >> { %v1182_v54 = vpack.c.bf16 %v1181_v1, %v1181_v1 }
 0x19c   : >> { %1185 = vst [vmem:[%s1184_s27] sm:$0xf] %v1182_v54 }
 0x19d PF: > { %s12_s9 = sadd.s32 1, %s1886_s9  }
 0x19e   : > { %p9_p5 = scmp.ge.s32.totalorder %s12_s9, 4  }
 0x1a0   :  { %11 = sbr.rel (!%p9_p5) target bundleno = 1 (0x1), region = 88 }

</bundles_post_ra>
